<compile_context>
chip_gen: v6e
topology: v6e:2x2x1
jax: 0.10.0
libtpu: 0.0.40
codegen_flags: <defaults>
</compile_context>

<pallas_src>
import functools

import jax
import jax.numpy as jnp
from jax.experimental import pallas as pl
from jax.experimental.pallas import tpu as pltpu

EPS = 1e-5  # nn.LayerNorm default


def _layernorm(x, w, b):
    x32 = x.astype(jnp.float32)
    mu = jnp.mean(x32, axis=-1, keepdims=True)
    var = jnp.mean((x32 - mu) ** 2, axis=-1, keepdims=True)
    return (x32 - mu) * jax.lax.rsqrt(var + EPS) * w + b


def _gelu_tanh(x):
    # TODO(synk): PyTorch F.gelu defaults to the exact erf-based GELU; the tanh
    # approximation is used here (and in the in-script reference) for robust
    # Mosaic lowering. |delta| vs exact GELU is ~1e-3.
    c = 0.7978845608028654  # sqrt(2/pi)
    return 0.5 * x * (1.0 + jnp.tanh(c * (x + 0.044715 * x * x * x)))


# ---------------------------------------------------------------------------
# Fused NPDecoderLayer kernel: one grid step per batch element.
# ---------------------------------------------------------------------------
def np_decoder_layer_kernel(
    x_ref, ctx_ref,
    ln1w_ref, ln1b_ref, lncw_ref, lncb_ref,
    wq_ref, wk_ref, wv_ref, wo_ref, bo_ref,
    ln2w_ref, ln2b_ref,
    w1a_ref, w1g_ref, b1a_ref, b1g_ref, w2_ref, b2_ref,
    o_ref,
    *, heads, dim_head, scale):
    x = x_ref[0].astype(jnp.float32)       # (N, D)
    ctx = ctx_ref[0].astype(jnp.float32)   # (M, D)

    # ---- cross-attention block: PreNorm(Attention) ----
    xn = _layernorm(x, ln1w_ref[...], ln1b_ref[...])       # (N, D)
    cn = _layernorm(ctx, lncw_ref[...], lncb_ref[...])     # (M, D)

    q = jnp.dot(xn, wq_ref[...], preferred_element_type=jnp.float32)   # (N, D)
    k = jnp.dot(cn, wk_ref[...], preferred_element_type=jnp.float32)   # (M, D)
    v = jnp.dot(cn, wv_ref[...], preferred_element_type=jnp.float32)   # (M, D)

    n, d = xn.shape
    attn_out = jnp.zeros((n, d), dtype=jnp.float32)
    for h in range(heads):                      # static unroll over heads
        lo = h * dim_head
        q_h = q[:, lo:lo + dim_head]            # (N, dh)
        k_h = k[:, lo:lo + dim_head]            # (M, dh)
        v_h = v[:, lo:lo + dim_head]            # (M, dh)
        # q_h @ k_h^T without materializing a transpose.
        sim = jax.lax.dot_general(
            q_h, k_h, (((1,), (1,)), ((), ())),
            preferred_element_type=jnp.float32) * scale    # (N, M)
        sim = sim - jnp.max(sim, axis=-1, keepdims=True)
        p = jnp.exp(sim)
        attn = p / jnp.sum(p, axis=-1, keepdims=True)
        o_h = jnp.dot(attn, v_h, preferred_element_type=jnp.float32)   # (N, dh)
        # concat_h(o_h) @ Wo == sum_h o_h @ Wo[h*dh:(h+1)*dh, :]
        attn_out = attn_out + jnp.dot(
            o_h, wo_ref[lo:lo + dim_head, :],
            preferred_element_type=jnp.float32)
    y1 = attn_out + bo_ref[...] + xn            # residual with the NORMED x

    # ---- feed-forward block: PreNorm(FeedForward with GEGLU) ----
    xn2 = _layernorm(y1, ln2w_ref[...], ln2b_ref[...])
    a = jnp.dot(xn2, w1a_ref[...], preferred_element_type=jnp.float32) + b1a_ref[...]
    g = jnp.dot(xn2, w1g_ref[...], preferred_element_type=jnp.float32) + b1g_ref[...]
    ff = jnp.dot(a * _gelu_tanh(g), w2_ref[...],
                 preferred_element_type=jnp.float32) + b2_ref[...]
    o_ref[0] = (ff + xn2).astype(o_ref.dtype)   # residual with the NORMED y1


def np_decoder_layer(x, context, params, *, heads):
    B, N, D = x.shape
    _, M, Dc = context.shape
    assert Dc == D and D % heads == 0
    dim_head = D // heads
    scale = float(dim_head) ** -0.5
    Fd = params["w2"].shape[0]

    # Host-side (zero-cost) weight splits: to_kv's chunk(2) and GEGLU's chunk(2)
    # are equivalent to two linears with split weight columns.
    wk = params["wkv"][:, :D]
    wv = params["wkv"][:, D:]
    w1a = params["w1"][:, :Fd]
    w1g = params["w1"][:, Fd:]
    b1a = params["b1"][:Fd].reshape(1, Fd)
    b1g = params["b1"][Fd:].reshape(1, Fd)
    vec = lambda p: p.reshape(1, -1)

    kernel = functools.partial(
        np_decoder_layer_kernel, heads=heads, dim_head=dim_head, scale=scale)

    def full2d(shape):
        return pl.BlockSpec(shape, lambda b: (0, 0))

    return pl.pallas_call(
        kernel,
        out_shape=jax.ShapeDtypeStruct((B, N, D), x.dtype),
        grid_spec=pltpu.PrefetchScalarGridSpec(
            num_scalar_prefetch=0,
            grid=(B,),
            in_specs=[
                pl.BlockSpec((1, N, D), lambda b: (b, 0, 0)),   # x
                pl.BlockSpec((1, M, D), lambda b: (b, 0, 0)),   # context
                full2d((1, D)), full2d((1, D)),                 # ln1 w, b
                full2d((1, D)), full2d((1, D)),                 # ln_ctx w, b
                full2d((D, D)),                                 # Wq
                full2d((D, D)), full2d((D, D)),                 # Wk, Wv
                full2d((D, D)), full2d((1, D)),                 # Wo, bo
                full2d((1, D)), full2d((1, D)),                 # ln2 w, b
                full2d((D, Fd)), full2d((D, Fd)),               # W1a, W1g
                full2d((1, Fd)), full2d((1, Fd)),               # b1a, b1g
                full2d((Fd, D)), full2d((1, D)),                # W2, b2
            ],
            out_specs=pl.BlockSpec((1, N, D), lambda b: (b, 0, 0)),
        ),
        compiler_params=pltpu.CompilerParams(
            dimension_semantics=("parallel",),
        ),
    )(x, context,
      vec(params["ln1_w"]), vec(params["ln1_b"]),
      vec(params["lnc_w"]), vec(params["lnc_b"]),
      params["wq"], wk, wv, params["wo"], vec(params["bo"]),
      vec(params["ln2_w"]), vec(params["ln2_b"]),
      w1a, w1g, b1a, b1g, params["w2"], vec(params["b2"]))


# ---------------------------------------------------------------------------
# Pure-JAX reference (mirrors the PyTorch module math)
# ---------------------------------------------------------------------------
def np_decoder_layer_reference(x, context, params, *, heads):
    B, N, D = x.shape
    M = context.shape[1]
    dh = D // heads
    scale = dh ** -0.5

    def ln(v, w, b):
        mu = v.mean(-1, keepdims=True)
        var = ((v - mu) ** 2).mean(-1, keepdims=True)
        return (v - mu) / jnp.sqrt(var + EPS) * w + b

    xn = ln(x, params["ln1_w"], params["ln1_b"])
    cn = ln(context, params["lnc_w"], params["lnc_b"])
    q = xn @ params["wq"]
    kv = cn @ params["wkv"]
    k, v = kv[..., :D], kv[..., D:]
    qh = q.reshape(B, N, heads, dh)
    kh = k.reshape(B, M, heads, dh)
    vh = v.reshape(B, M, heads, dh)
    sim = jnp.einsum("bnhd,bmhd->bhnm", qh, kh) * scale
    attn = jax.nn.softmax(sim, axis=-1)
    out = jnp.einsum("bhnm,bmhd->bnhd", attn, vh).reshape(B, N, D)
    y1 = out @ params["wo"] + params["bo"] + xn

    xn2 = ln(y1, params["ln2_w"], params["ln2_b"])
    h = xn2 @ params["w1"] + params["b1"]
    Fd = params["w2"].shape[0]
    a, g = h[..., :Fd], h[..., Fd:]
    return (a * _gelu_tanh(g)) @ params["w2"] + params["b2"] + xn2


if __name__ == "__main__":
    # d_model=128 keeps every block lane-dense (128 lanes); nhead=4 -> dim_head=32.
    B, N, M = 2, 8, 16
    D = 128          # d_model / latent_dim
    heads = 4        # nhead
    Fd = 128         # dim_feedforward

    key = jax.random.PRNGKey(0)
    ks = jax.random.split(key, 18)
    x = jax.random.normal(ks[0], (B, N, D), dtype=jnp.float32)
    context = jax.random.normal(ks[1], (B, M, D), dtype=jnp.float32)

    s = 0.1
    params = {
        "ln1_w": 1.0 + 0.01 * jax.random.normal(ks[2], (D,), jnp.float32),
        "ln1_b": 0.01 * jax.random.normal(ks[3], (D,), jnp.float32),
        "lnc_w": 1.0 + 0.01 * jax.random.normal(ks[4], (D,), jnp.float32),
        "lnc_b": 0.01 * jax.random.normal(ks[5], (D,), jnp.float32),
        "wq": s * jax.random.normal(ks[6], (D, D), jnp.float32),
        "wkv": s * jax.random.normal(ks[7], (D, 2 * D), jnp.float32),
        "wo": s * jax.random.normal(ks[8], (D, D), jnp.float32),
        "bo": 0.01 * jax.random.normal(ks[9], (D,), jnp.float32),
        "ln2_w": 1.0 + 0.01 * jax.random.normal(ks[10], (D,), jnp.float32),
        "ln2_b": 0.01 * jax.random.normal(ks[11], (D,), jnp.float32),
        "w1": s * jax.random.normal(ks[12], (D, 2 * Fd), jnp.float32),
        "b1": 0.01 * jax.random.normal(ks[13], (2 * Fd,), jnp.float32),
        "w2": s * jax.random.normal(ks[14], (Fd, D), jnp.float32),
        "b2": 0.01 * jax.random.normal(ks[15], (D,), jnp.float32),
    }

    out = np_decoder_layer(x, context, params, heads=heads)
    out = jax.block_until_ready(out)

    ref = np_decoder_layer_reference(x, context, params, heads=heads)
    assert out.shape == (B, N, D)
    err = jnp.max(jnp.abs(out - ref))
    assert jnp.allclose(out, ref, atol=1e-4, rtol=1e-4), f"mismatch vs reference, max err {err}"
    print("KERNEL_OK")
</pallas_src>

<mosaic_0001>
module attributes {stable_mosaic.version = 11 : i64} {
  func.func @np_decoder_layer_kernel(%arg0: i32, %arg1: memref<1x8x128xf32, #tpu.memory_space<vmem>>, %arg2: memref<1x16x128xf32, #tpu.memory_space<vmem>>, %arg3: memref<1x128xf32, #tpu.memory_space<vmem>>, %arg4: memref<1x128xf32, #tpu.memory_space<vmem>>, %arg5: memref<1x128xf32, #tpu.memory_space<vmem>>, %arg6: memref<1x128xf32, #tpu.memory_space<vmem>>, %arg7: memref<128x128xf32, #tpu.memory_space<vmem>>, %arg8: memref<128x128xf32, #tpu.memory_space<vmem>>, %arg9: memref<128x128xf32, #tpu.memory_space<vmem>>, %arg10: memref<128x128xf32, #tpu.memory_space<vmem>>, %arg11: memref<1x128xf32, #tpu.memory_space<vmem>>, %arg12: memref<1x128xf32, #tpu.memory_space<vmem>>, %arg13: memref<1x128xf32, #tpu.memory_space<vmem>>, %arg14: memref<128x128xf32, #tpu.memory_space<vmem>>, %arg15: memref<128x128xf32, #tpu.memory_space<vmem>>, %arg16: memref<1x128xf32, #tpu.memory_space<vmem>>, %arg17: memref<1x128xf32, #tpu.memory_space<vmem>>, %arg18: memref<128x128xf32, #tpu.memory_space<vmem>>, %arg19: memref<1x128xf32, #tpu.memory_space<vmem>>, %arg20: memref<1x8x128xf32, #tpu.memory_space<vmem>>) attributes {dimension_semantics = [#tpu.dimension_semantics<parallel>], iteration_bounds = array<i64: 2>, scalar_prefetch = 0 : i64, scratch_operands = 0 : i64, tpu.core_type = #tpu.core_type<tc>, window_params = [{transform_indices = @transform_0, window_bounds = array<i64: 1, 8, 128>}, {transform_indices = @transform_1, window_bounds = array<i64: 1, 16, 128>}, {pipeline_mode = #tpu.pipeline_mode<synchronous>, transform_indices = @transform_2, window_bounds = array<i64: 1, 128>}, {pipeline_mode = #tpu.pipeline_mode<synchronous>, transform_indices = @transform_3, window_bounds = array<i64: 1, 128>}, {pipeline_mode = #tpu.pipeline_mode<synchronous>, transform_indices = @transform_4, window_bounds = array<i64: 1, 128>}, {pipeline_mode = #tpu.pipeline_mode<synchronous>, transform_indices = @transform_5, window_bounds = array<i64: 1, 128>}, {pipeline_mode = #tpu.pipeline_mode<synchronous>, transform_indices = @transform_6, window_bounds = array<i64: 128, 128>}, {pipeline_mode = #tpu.pipeline_mode<synchronous>, transform_indices = @transform_7, window_bounds = array<i64: 128, 128>}, {pipeline_mode = #tpu.pipeline_mode<synchronous>, transform_indices = @transform_8, window_bounds = array<i64: 128, 128>}, {pipeline_mode = #tpu.pipeline_mode<synchronous>, transform_indices = @transform_9, window_bounds = array<i64: 128, 128>}, {pipeline_mode = #tpu.pipeline_mode<synchronous>, transform_indices = @transform_10, window_bounds = array<i64: 1, 128>}, {pipeline_mode = #tpu.pipeline_mode<synchronous>, transform_indices = @transform_11, window_bounds = array<i64: 1, 128>}, {pipeline_mode = #tpu.pipeline_mode<synchronous>, transform_indices = @transform_12, window_bounds = array<i64: 1, 128>}, {pipeline_mode = #tpu.pipeline_mode<synchronous>, transform_indices = @transform_13, window_bounds = array<i64: 128, 128>}, {pipeline_mode = #tpu.pipeline_mode<synchronous>, transform_indices = @transform_14, window_bounds = array<i64: 128, 128>}, {pipeline_mode = #tpu.pipeline_mode<synchronous>, transform_indices = @transform_15, window_bounds = array<i64: 1, 128>}, {pipeline_mode = #tpu.pipeline_mode<synchronous>, transform_indices = @transform_16, window_bounds = array<i64: 1, 128>}, {pipeline_mode = #tpu.pipeline_mode<synchronous>, transform_indices = @transform_17, window_bounds = array<i64: 128, 128>}, {pipeline_mode = #tpu.pipeline_mode<synchronous>, transform_indices = @transform_18, window_bounds = array<i64: 1, 128>}, {transform_indices = @transform_19, window_bounds = array<i64: 1, 8, 128>}]} {
    %c0 = arith.constant 0 : index
    %c0_0 = arith.constant 0 : index
    %c0_1 = arith.constant 0 : index
    %0 = vector.load %arg1[%c0, %c0_0, %c0_1] : memref<1x8x128xf32, #tpu.memory_space<vmem>>, vector<1x8x128xf32>
    %1 = vector.shape_cast %0 : vector<1x8x128xf32> to vector<8x128xf32>
    %c0_2 = arith.constant 0 : index
    %c0_3 = arith.constant 0 : index
    %c0_4 = arith.constant 0 : index
    %2 = vector.load %arg2[%c0_2, %c0_3, %c0_4] : memref<1x16x128xf32, #tpu.memory_space<vmem>>, vector<1x16x128xf32>
    %3 = vector.shape_cast %2 : vector<1x16x128xf32> to vector<16x128xf32>
    %c0_5 = arith.constant 0 : index
    %c0_6 = arith.constant 0 : index
    %4 = vector.load %arg3[%c0_5, %c0_6] : memref<1x128xf32, #tpu.memory_space<vmem>>, vector<1x128xf32>
    %c0_7 = arith.constant 0 : index
    %c0_8 = arith.constant 0 : index
    %5 = vector.load %arg4[%c0_7, %c0_8] : memref<1x128xf32, #tpu.memory_space<vmem>>, vector<1x128xf32>
    %cst = arith.constant dense<0.000000e+00> : vector<8xf32>
    %6 = vector.multi_reduction <add>, %1, %cst [1] : vector<8x128xf32> to vector<8xf32>
    %7 = vector.shape_cast %6 : vector<8xf32> to vector<8x1xf32>
    %cst_9 = arith.constant 1.280000e+02 : f32
    %8 = vector.broadcast %cst_9 : f32 to vector<8x1xf32>
    %9 = arith.divf %7, %8 : vector<8x1xf32>
    %10 = vector.broadcast %9 : vector<8x1xf32> to vector<8x128xf32>
    %11 = arith.subf %1, %10 : vector<8x128xf32>
    %12 = arith.mulf %11, %11 : vector<8x128xf32>
    %cst_10 = arith.constant dense<0.000000e+00> : vector<8xf32>
    %13 = vector.multi_reduction <add>, %12, %cst_10 [1] : vector<8x128xf32> to vector<8xf32>
    %14 = vector.shape_cast %13 : vector<8xf32> to vector<8x1xf32>
    %cst_11 = arith.constant 1.280000e+02 : f32
    %15 = vector.broadcast %cst_11 : f32 to vector<8x1xf32>
    %16 = arith.divf %14, %15 : vector<8x1xf32>
    %17 = vector.broadcast %9 : vector<8x1xf32> to vector<8x128xf32>
    %18 = arith.subf %1, %17 : vector<8x128xf32>
    %cst_12 = arith.constant 9.99999974E-6 : f32
    %19 = vector.broadcast %cst_12 : f32 to vector<8x1xf32>
    %20 = arith.addf %16, %19 : vector<8x1xf32>
    %21 = math.rsqrt %20 : vector<8x1xf32>
    %22 = vector.broadcast %21 : vector<8x1xf32> to vector<8x128xf32>
    %23 = arith.mulf %18, %22 : vector<8x128xf32>
    %24 = vector.broadcast %4 : vector<1x128xf32> to vector<8x128xf32>
    %25 = arith.mulf %23, %24 : vector<8x128xf32>
    %26 = vector.broadcast %5 : vector<1x128xf32> to vector<8x128xf32>
    %27 = arith.addf %25, %26 : vector<8x128xf32>
    %c0_13 = arith.constant 0 : index
    %c0_14 = arith.constant 0 : index
    %28 = vector.load %arg5[%c0_13, %c0_14] : memref<1x128xf32, #tpu.memory_space<vmem>>, vector<1x128xf32>
    %c0_15 = arith.constant 0 : index
    %c0_16 = arith.constant 0 : index
    %29 = vector.load %arg6[%c0_15, %c0_16] : memref<1x128xf32, #tpu.memory_space<vmem>>, vector<1x128xf32>
    %cst_17 = arith.constant dense<0.000000e+00> : vector<16xf32>
    %30 = vector.multi_reduction <add>, %3, %cst_17 [1] : vector<16x128xf32> to vector<16xf32>
    %31 = vector.shape_cast %30 : vector<16xf32> to vector<16x1xf32>
    %cst_18 = arith.constant 1.280000e+02 : f32
    %32 = vector.broadcast %cst_18 : f32 to vector<16x1xf32>
    %33 = arith.divf %31, %32 : vector<16x1xf32>
    %34 = vector.broadcast %33 : vector<16x1xf32> to vector<16x128xf32>
    %35 = arith.subf %3, %34 : vector<16x128xf32>
    %36 = arith.mulf %35, %35 : vector<16x128xf32>
    %cst_19 = arith.constant dense<0.000000e+00> : vector<16xf32>
    %37 = vector.multi_reduction <add>, %36, %cst_19 [1] : vector<16x128xf32> to vector<16xf32>
    %38 = vector.shape_cast %37 : vector<16xf32> to vector<16x1xf32>
    %cst_20 = arith.constant 1.280000e+02 : f32
    %39 = vector.broadcast %cst_20 : f32 to vector<16x1xf32>
    %40 = arith.divf %38, %39 : vector<16x1xf32>
    %41 = vector.broadcast %33 : vector<16x1xf32> to vector<16x128xf32>
    %42 = arith.subf %3, %41 : vector<16x128xf32>
    %cst_21 = arith.constant 9.99999974E-6 : f32
    %43 = vector.broadcast %cst_21 : f32 to vector<16x1xf32>
    %44 = arith.addf %40, %43 : vector<16x1xf32>
    %45 = math.rsqrt %44 : vector<16x1xf32>
    %46 = vector.broadcast %45 : vector<16x1xf32> to vector<16x128xf32>
    %47 = arith.mulf %42, %46 : vector<16x128xf32>
    %48 = vector.broadcast %28 : vector<1x128xf32> to vector<16x128xf32>
    %49 = arith.mulf %47, %48 : vector<16x128xf32>
    %50 = vector.broadcast %29 : vector<1x128xf32> to vector<16x128xf32>
    %51 = arith.addf %49, %50 : vector<16x128xf32>
    %c0_22 = arith.constant 0 : index
    %c0_23 = arith.constant 0 : index
    %52 = vector.load %arg7[%c0_22, %c0_23] : memref<128x128xf32, #tpu.memory_space<vmem>>, vector<128x128xf32>
    %cst_24 = arith.constant dense<0.000000e+00> : vector<8x128xf32>
    %53 = tpu.matmul %27, %52, %cst_24 {dimension_numbers = #tpu.dot_dimension_numbers<[1], [0], [0], [1], [0, 0, 1, 1], [], []>} : vector<8x128xf32>, vector<128x128xf32>, vector<8x128xf32> -> vector<8x128xf32>
    %c0_25 = arith.constant 0 : index
    %c0_26 = arith.constant 0 : index
    %54 = vector.load %arg8[%c0_25, %c0_26] : memref<128x128xf32, #tpu.memory_space<vmem>>, vector<128x128xf32>
    %cst_27 = arith.constant dense<0.000000e+00> : vector<16x128xf32>
    %55 = tpu.matmul %51, %54, %cst_27 {dimension_numbers = #tpu.dot_dimension_numbers<[1], [0], [0], [1], [0, 0, 1, 1], [], []>} : vector<16x128xf32>, vector<128x128xf32>, vector<16x128xf32> -> vector<16x128xf32>
    %c0_28 = arith.constant 0 : index
    %c0_29 = arith.constant 0 : index
    %56 = vector.load %arg9[%c0_28, %c0_29] : memref<128x128xf32, #tpu.memory_space<vmem>>, vector<128x128xf32>
    %cst_30 = arith.constant dense<0.000000e+00> : vector<16x128xf32>
    %57 = tpu.matmul %51, %56, %cst_30 {dimension_numbers = #tpu.dot_dimension_numbers<[1], [0], [0], [1], [0, 0, 1, 1], [], []>} : vector<16x128xf32>, vector<128x128xf32>, vector<16x128xf32> -> vector<16x128xf32>
    %cst_31 = arith.constant 0.000000e+00 : f32
    %58 = vector.broadcast %cst_31 : f32 to vector<8x128xf32>
    %59 = vector.extract_strided_slice %53 {offsets = [0, 0], sizes = [8, 32], strides = [1, 1]} : vector<8x128xf32> to vector<8x32xf32>
    %60 = vector.extract_strided_slice %55 {offsets = [0, 0], sizes = [16, 32], strides = [1, 1]} : vector<16x128xf32> to vector<16x32xf32>
    %61 = vector.extract_strided_slice %57 {offsets = [0, 0], sizes = [16, 32], strides = [1, 1]} : vector<16x128xf32> to vector<16x32xf32>
    %cst_32 = arith.constant dense<0.000000e+00> : vector<8x16xf32>
    %62 = tpu.matmul %59, %60, %cst_32 {dimension_numbers = #tpu.dot_dimension_numbers<[1], [1], [0], [0], [0, 0, 1, 0], [], []>} : vector<8x32xf32>, vector<16x32xf32>, vector<8x16xf32> -> vector<8x16xf32>
    %cst_33 = arith.constant 0.176776692 : f32
    %63 = vector.broadcast %cst_33 : f32 to vector<8x16xf32>
    %64 = arith.mulf %62, %63 : vector<8x16xf32>
    %cst_34 = arith.constant dense<0xFF800000> : vector<8xf32>
    %65 = vector.multi_reduction <maximumf>, %64, %cst_34 [1] : vector<8x16xf32> to vector<8xf32>
    %66 = vector.shape_cast %65 : vector<8xf32> to vector<8x1xf32>
    %67 = vector.broadcast %66 : vector<8x1xf32> to vector<8x16xf32>
    %68 = arith.subf %64, %67 : vector<8x16xf32>
    %69 = math.exp %68 : vector<8x16xf32>
    %cst_35 = arith.constant dense<0.000000e+00> : vector<8xf32>
    %70 = vector.multi_reduction <add>, %69, %cst_35 [1] : vector<8x16xf32> to vector<8xf32>
    %71 = vector.shape_cast %70 : vector<8xf32> to vector<8x1xf32>
    %72 = vector.broadcast %71 : vector<8x1xf32> to vector<8x16xf32>
    %73 = arith.divf %69, %72 : vector<8x16xf32>
    %cst_36 = arith.constant dense<0.000000e+00> : vector<8x32xf32>
    %74 = tpu.matmul %73, %61, %cst_36 {dimension_numbers = #tpu.dot_dimension_numbers<[1], [0], [0], [1], [0, 0, 1, 1], [], []>} : vector<8x16xf32>, vector<16x32xf32>, vector<8x32xf32> -> vector<8x32xf32>
    %c0_37 = arith.constant 0 : index
    %c0_38 = arith.constant 0 : index
    %75 = vector.load %arg10[%c0_37, %c0_38] : memref<128x128xf32, #tpu.memory_space<vmem>>, vector<32x128xf32>
    %cst_39 = arith.constant dense<0.000000e+00> : vector<8x128xf32>
    %76 = tpu.matmul %74, %75, %cst_39 {dimension_numbers = #tpu.dot_dimension_numbers<[1], [0], [0], [1], [0, 0, 1, 1], [], []>} : vector<8x32xf32>, vector<32x128xf32>, vector<8x128xf32> -> vector<8x128xf32>
    %77 = arith.addf %58, %76 : vector<8x128xf32>
    %78 = vector.extract_strided_slice %53 {offsets = [0, 32], sizes = [8, 32], strides = [1, 1]} : vector<8x128xf32> to vector<8x32xf32>
    %79 = vector.extract_strided_slice %55 {offsets = [0, 32], sizes = [16, 32], strides = [1, 1]} : vector<16x128xf32> to vector<16x32xf32>
    %80 = vector.extract_strided_slice %57 {offsets = [0, 32], sizes = [16, 32], strides = [1, 1]} : vector<16x128xf32> to vector<16x32xf32>
    %cst_40 = arith.constant dense<0.000000e+00> : vector<8x16xf32>
    %81 = tpu.matmul %78, %79, %cst_40 {dimension_numbers = #tpu.dot_dimension_numbers<[1], [1], [0], [0], [0, 0, 1, 0], [], []>} : vector<8x32xf32>, vector<16x32xf32>, vector<8x16xf32> -> vector<8x16xf32>
    %cst_41 = arith.constant 0.176776692 : f32
    %82 = vector.broadcast %cst_41 : f32 to vector<8x16xf32>
    %83 = arith.mulf %81, %82 : vector<8x16xf32>
    %cst_42 = arith.constant dense<0xFF800000> : vector<8xf32>
    %84 = vector.multi_reduction <maximumf>, %83, %cst_42 [1] : vector<8x16xf32> to vector<8xf32>
    %85 = vector.shape_cast %84 : vector<8xf32> to vector<8x1xf32>
    %86 = vector.broadcast %85 : vector<8x1xf32> to vector<8x16xf32>
    %87 = arith.subf %83, %86 : vector<8x16xf32>
    %88 = math.exp %87 : vector<8x16xf32>
    %cst_43 = arith.constant dense<0.000000e+00> : vector<8xf32>
    %89 = vector.multi_reduction <add>, %88, %cst_43 [1] : vector<8x16xf32> to vector<8xf32>
    %90 = vector.shape_cast %89 : vector<8xf32> to vector<8x1xf32>
    %91 = vector.broadcast %90 : vector<8x1xf32> to vector<8x16xf32>
    %92 = arith.divf %88, %91 : vector<8x16xf32>
    %cst_44 = arith.constant dense<0.000000e+00> : vector<8x32xf32>
    %93 = tpu.matmul %92, %80, %cst_44 {dimension_numbers = #tpu.dot_dimension_numbers<[1], [0], [0], [1], [0, 0, 1, 1], [], []>} : vector<8x16xf32>, vector<16x32xf32>, vector<8x32xf32> -> vector<8x32xf32>
    %c32 = arith.constant 32 : index
    %c0_45 = arith.constant 0 : index
    %94 = vector.load %arg10[%c32, %c0_45] : memref<128x128xf32, #tpu.memory_space<vmem>>, vector<32x128xf32>
    %cst_46 = arith.constant dense<0.000000e+00> : vector<8x128xf32>
    %95 = tpu.matmul %93, %94, %cst_46 {dimension_numbers = #tpu.dot_dimension_numbers<[1], [0], [0], [1], [0, 0, 1, 1], [], []>} : vector<8x32xf32>, vector<32x128xf32>, vector<8x128xf32> -> vector<8x128xf32>
    %96 = arith.addf %77, %95 : vector<8x128xf32>
    %97 = vector.extract_strided_slice %53 {offsets = [0, 64], sizes = [8, 32], strides = [1, 1]} : vector<8x128xf32> to vector<8x32xf32>
    %98 = vector.extract_strided_slice %55 {offsets = [0, 64], sizes = [16, 32], strides = [1, 1]} : vector<16x128xf32> to vector<16x32xf32>
    %99 = vector.extract_strided_slice %57 {offsets = [0, 64], sizes = [16, 32], strides = [1, 1]} : vector<16x128xf32> to vector<16x32xf32>
    %cst_47 = arith.constant dense<0.000000e+00> : vector<8x16xf32>
    %100 = tpu.matmul %97, %98, %cst_47 {dimension_numbers = #tpu.dot_dimension_numbers<[1], [1], [0], [0], [0, 0, 1, 0], [], []>} : vector<8x32xf32>, vector<16x32xf32>, vector<8x16xf32> -> vector<8x16xf32>
    %cst_48 = arith.constant 0.176776692 : f32
    %101 = vector.broadcast %cst_48 : f32 to vector<8x16xf32>
    %102 = arith.mulf %100, %101 : vector<8x16xf32>
    %cst_49 = arith.constant dense<0xFF800000> : vector<8xf32>
    %103 = vector.multi_reduction <maximumf>, %102, %cst_49 [1] : vector<8x16xf32> to vector<8xf32>
    %104 = vector.shape_cast %103 : vector<8xf32> to vector<8x1xf32>
    %105 = vector.broadcast %104 : vector<8x1xf32> to vector<8x16xf32>
    %106 = arith.subf %102, %105 : vector<8x16xf32>
    %107 = math.exp %106 : vector<8x16xf32>
    %cst_50 = arith.constant dense<0.000000e+00> : vector<8xf32>
    %108 = vector.multi_reduction <add>, %107, %cst_50 [1] : vector<8x16xf32> to vector<8xf32>
    %109 = vector.shape_cast %108 : vector<8xf32> to vector<8x1xf32>
    %110 = vector.broadcast %109 : vector<8x1xf32> to vector<8x16xf32>
    %111 = arith.divf %107, %110 : vector<8x16xf32>
    %cst_51 = arith.constant dense<0.000000e+00> : vector<8x32xf32>
    %112 = tpu.matmul %111, %99, %cst_51 {dimension_numbers = #tpu.dot_dimension_numbers<[1], [0], [0], [1], [0, 0, 1, 1], [], []>} : vector<8x16xf32>, vector<16x32xf32>, vector<8x32xf32> -> vector<8x32xf32>
    %c64 = arith.constant 64 : index
    %c0_52 = arith.constant 0 : index
    %113 = vector.load %arg10[%c64, %c0_52] : memref<128x128xf32, #tpu.memory_space<vmem>>, vector<32x128xf32>
    %cst_53 = arith.constant dense<0.000000e+00> : vector<8x128xf32>
    %114 = tpu.matmul %112, %113, %cst_53 {dimension_numbers = #tpu.dot_dimension_numbers<[1], [0], [0], [1], [0, 0, 1, 1], [], []>} : vector<8x32xf32>, vector<32x128xf32>, vector<8x128xf32> -> vector<8x128xf32>
    %115 = arith.addf %96, %114 : vector<8x128xf32>
    %116 = vector.extract_strided_slice %53 {offsets = [0, 96], sizes = [8, 32], strides = [1, 1]} : vector<8x128xf32> to vector<8x32xf32>
    %117 = vector.extract_strided_slice %55 {offsets = [0, 96], sizes = [16, 32], strides = [1, 1]} : vector<16x128xf32> to vector<16x32xf32>
    %118 = vector.extract_strided_slice %57 {offsets = [0, 96], sizes = [16, 32], strides = [1, 1]} : vector<16x128xf32> to vector<16x32xf32>
    %cst_54 = arith.constant dense<0.000000e+00> : vector<8x16xf32>
    %119 = tpu.matmul %116, %117, %cst_54 {dimension_numbers = #tpu.dot_dimension_numbers<[1], [1], [0], [0], [0, 0, 1, 0], [], []>} : vector<8x32xf32>, vector<16x32xf32>, vector<8x16xf32> -> vector<8x16xf32>
    %cst_55 = arith.constant 0.176776692 : f32
    %120 = vector.broadcast %cst_55 : f32 to vector<8x16xf32>
    %121 = arith.mulf %119, %120 : vector<8x16xf32>
    %cst_56 = arith.constant dense<0xFF800000> : vector<8xf32>
    %122 = vector.multi_reduction <maximumf>, %121, %cst_56 [1] : vector<8x16xf32> to vector<8xf32>
    %123 = vector.shape_cast %122 : vector<8xf32> to vector<8x1xf32>
    %124 = vector.broadcast %123 : vector<8x1xf32> to vector<8x16xf32>
    %125 = arith.subf %121, %124 : vector<8x16xf32>
    %126 = math.exp %125 : vector<8x16xf32>
    %cst_57 = arith.constant dense<0.000000e+00> : vector<8xf32>
    %127 = vector.multi_reduction <add>, %126, %cst_57 [1] : vector<8x16xf32> to vector<8xf32>
    %128 = vector.shape_cast %127 : vector<8xf32> to vector<8x1xf32>
    %129 = vector.broadcast %128 : vector<8x1xf32> to vector<8x16xf32>
    %130 = arith.divf %126, %129 : vector<8x16xf32>
    %cst_58 = arith.constant dense<0.000000e+00> : vector<8x32xf32>
    %131 = tpu.matmul %130, %118, %cst_58 {dimension_numbers = #tpu.dot_dimension_numbers<[1], [0], [0], [1], [0, 0, 1, 1], [], []>} : vector<8x16xf32>, vector<16x32xf32>, vector<8x32xf32> -> vector<8x32xf32>
    %c96 = arith.constant 96 : index
    %c0_59 = arith.constant 0 : index
    %132 = vector.load %arg10[%c96, %c0_59] : memref<128x128xf32, #tpu.memory_space<vmem>>, vector<32x128xf32>
    %cst_60 = arith.constant dense<0.000000e+00> : vector<8x128xf32>
    %133 = tpu.matmul %131, %132, %cst_60 {dimension_numbers = #tpu.dot_dimension_numbers<[1], [0], [0], [1], [0, 0, 1, 1], [], []>} : vector<8x32xf32>, vector<32x128xf32>, vector<8x128xf32> -> vector<8x128xf32>
    %134 = arith.addf %115, %133 : vector<8x128xf32>
    %c0_61 = arith.constant 0 : index
    %c0_62 = arith.constant 0 : index
    %135 = vector.load %arg11[%c0_61, %c0_62] : memref<1x128xf32, #tpu.memory_space<vmem>>, vector<1x128xf32>
    %136 = vector.broadcast %135 : vector<1x128xf32> to vector<8x128xf32>
    %137 = arith.addf %134, %136 : vector<8x128xf32>
    %138 = arith.addf %137, %27 : vector<8x128xf32>
    %c0_63 = arith.constant 0 : index
    %c0_64 = arith.constant 0 : index
    %139 = vector.load %arg12[%c0_63, %c0_64] : memref<1x128xf32, #tpu.memory_space<vmem>>, vector<1x128xf32>
    %c0_65 = arith.constant 0 : index
    %c0_66 = arith.constant 0 : index
    %140 = vector.load %arg13[%c0_65, %c0_66] : memref<1x128xf32, #tpu.memory_space<vmem>>, vector<1x128xf32>
    %cst_67 = arith.constant dense<0.000000e+00> : vector<8xf32>
    %141 = vector.multi_reduction <add>, %138, %cst_67 [1] : vector<8x128xf32> to vector<8xf32>
    %142 = vector.shape_cast %141 : vector<8xf32> to vector<8x1xf32>
    %cst_68 = arith.constant 1.280000e+02 : f32
    %143 = vector.broadcast %cst_68 : f32 to vector<8x1xf32>
    %144 = arith.divf %142, %143 : vector<8x1xf32>
    %145 = vector.broadcast %144 : vector<8x1xf32> to vector<8x128xf32>
    %146 = arith.subf %138, %145 : vector<8x128xf32>
    %147 = arith.mulf %146, %146 : vector<8x128xf32>
    %cst_69 = arith.constant dense<0.000000e+00> : vector<8xf32>
    %148 = vector.multi_reduction <add>, %147, %cst_69 [1] : vector<8x128xf32> to vector<8xf32>
    %149 = vector.shape_cast %148 : vector<8xf32> to vector<8x1xf32>
    %cst_70 = arith.constant 1.280000e+02 : f32
    %150 = vector.broadcast %cst_70 : f32 to vector<8x1xf32>
    %151 = arith.divf %149, %150 : vector<8x1xf32>
    %152 = vector.broadcast %144 : vector<8x1xf32> to vector<8x128xf32>
    %153 = arith.subf %138, %152 : vector<8x128xf32>
    %cst_71 = arith.constant 9.99999974E-6 : f32
    %154 = vector.broadcast %cst_71 : f32 to vector<8x1xf32>
    %155 = arith.addf %151, %154 : vector<8x1xf32>
    %156 = math.rsqrt %155 : vector<8x1xf32>
    %157 = vector.broadcast %156 : vector<8x1xf32> to vector<8x128xf32>
    %158 = arith.mulf %153, %157 : vector<8x128xf32>
    %159 = vector.broadcast %139 : vector<1x128xf32> to vector<8x128xf32>
    %160 = arith.mulf %158, %159 : vector<8x128xf32>
    %161 = vector.broadcast %140 : vector<1x128xf32> to vector<8x128xf32>
    %162 = arith.addf %160, %161 : vector<8x128xf32>
    %c0_72 = arith.constant 0 : index
    %c0_73 = arith.constant 0 : index
    %163 = vector.load %arg14[%c0_72, %c0_73] : memref<128x128xf32, #tpu.memory_space<vmem>>, vector<128x128xf32>
    %cst_74 = arith.constant dense<0.000000e+00> : vector<8x128xf32>
    %164 = tpu.matmul %162, %163, %cst_74 {dimension_numbers = #tpu.dot_dimension_numbers<[1], [0], [0], [1], [0, 0, 1, 1], [], []>} : vector<8x128xf32>, vector<128x128xf32>, vector<8x128xf32> -> vector<8x128xf32>
    %c0_75 = arith.constant 0 : index
    %c0_76 = arith.constant 0 : index
    %165 = vector.load %arg16[%c0_75, %c0_76] : memref<1x128xf32, #tpu.memory_space<vmem>>, vector<1x128xf32>
    %166 = vector.broadcast %165 : vector<1x128xf32> to vector<8x128xf32>
    %167 = arith.addf %164, %166 : vector<8x128xf32>
    %c0_77 = arith.constant 0 : index
    %c0_78 = arith.constant 0 : index
    %168 = vector.load %arg15[%c0_77, %c0_78] : memref<128x128xf32, #tpu.memory_space<vmem>>, vector<128x128xf32>
    %cst_79 = arith.constant dense<0.000000e+00> : vector<8x128xf32>
    %169 = tpu.matmul %162, %168, %cst_79 {dimension_numbers = #tpu.dot_dimension_numbers<[1], [0], [0], [1], [0, 0, 1, 1], [], []>} : vector<8x128xf32>, vector<128x128xf32>, vector<8x128xf32> -> vector<8x128xf32>
    %c0_80 = arith.constant 0 : index
    %c0_81 = arith.constant 0 : index
    %170 = vector.load %arg17[%c0_80, %c0_81] : memref<1x128xf32, #tpu.memory_space<vmem>>, vector<1x128xf32>
    %171 = vector.broadcast %170 : vector<1x128xf32> to vector<8x128xf32>
    %172 = arith.addf %169, %171 : vector<8x128xf32>
    %cst_82 = arith.constant 5.000000e-01 : f32
    %173 = vector.broadcast %cst_82 : f32 to vector<8x128xf32>
    %174 = arith.mulf %173, %172 : vector<8x128xf32>
    %cst_83 = arith.constant 4.471500e-02 : f32
    %175 = vector.broadcast %cst_83 : f32 to vector<8x128xf32>
    %176 = arith.mulf %175, %172 : vector<8x128xf32>
    %177 = arith.mulf %176, %172 : vector<8x128xf32>
    %178 = arith.mulf %177, %172 : vector<8x128xf32>
    %179 = arith.addf %172, %178 : vector<8x128xf32>
    %cst_84 = arith.constant 0.797884583 : f32
    %180 = vector.broadcast %cst_84 : f32 to vector<8x128xf32>
    %181 = arith.mulf %180, %179 : vector<8x128xf32>
    %182 = math.tanh %181 : vector<8x128xf32>
    %cst_85 = arith.constant 1.000000e+00 : f32
    %183 = vector.broadcast %cst_85 : f32 to vector<8x128xf32>
    %184 = arith.addf %183, %182 : vector<8x128xf32>
    %185 = arith.mulf %174, %184 : vector<8x128xf32>
    %186 = arith.mulf %167, %185 : vector<8x128xf32>
    %c0_86 = arith.constant 0 : index
    %c0_87 = arith.constant 0 : index
    %187 = vector.load %arg18[%c0_86, %c0_87] : memref<128x128xf32, #tpu.memory_space<vmem>>, vector<128x128xf32>
    %cst_88 = arith.constant dense<0.000000e+00> : vector<8x128xf32>
    %188 = tpu.matmul %186, %187, %cst_88 {dimension_numbers = #tpu.dot_dimension_numbers<[1], [0], [0], [1], [0, 0, 1, 1], [], []>} : vector<8x128xf32>, vector<128x128xf32>, vector<8x128xf32> -> vector<8x128xf32>
    %c0_89 = arith.constant 0 : index
    %c0_90 = arith.constant 0 : index
    %189 = vector.load %arg19[%c0_89, %c0_90] : memref<1x128xf32, #tpu.memory_space<vmem>>, vector<1x128xf32>
    %190 = vector.broadcast %189 : vector<1x128xf32> to vector<8x128xf32>
    %191 = arith.addf %188, %190 : vector<8x128xf32>
    %192 = arith.addf %191, %162 : vector<8x128xf32>
    %c0_91 = arith.constant 0 : index
    %c0_92 = arith.constant 0 : index
    %c0_93 = arith.constant 0 : index
    %193 = vector.load %arg20[%c0_91, %c0_92, %c0_93] : memref<1x8x128xf32, #tpu.memory_space<vmem>>, vector<1x8x128xf32>
    %194 = vector.shape_cast %193 : vector<1x8x128xf32> to vector<8x128xf32>
    %195 = vector.shape_cast %192 : vector<8x128xf32> to vector<1x8x128xf32>
    tpu.vector_store %arg20[%c0_91, %c0_92, %c0_93], %195 {strides = array<i32>} : memref<1x8x128xf32, #tpu.memory_space<vmem>>, vector<1x8x128xf32>,
    return
  }
  func.func @transform_0(%arg0: i32) -> (i32, i32, i32) {
    %c0_i32 = arith.constant 0 : i32
    %c0_i32_0 = arith.constant 0 : i32
    %c0_i32_1 = arith.constant 0 : i32
    return %arg0, %c0_i32, %c0_i32_0 : i32, i32, i32
  }
  func.func @transform_1(%arg0: i32) -> (i32, i32, i32) {
    %c0_i32 = arith.constant 0 : i32
    %c0_i32_0 = arith.constant 0 : i32
    %c0_i32_1 = arith.constant 0 : i32
    return %arg0, %c0_i32, %c0_i32_0 : i32, i32, i32
  }
  func.func @transform_2(%arg0: i32) -> (i32, i32) {
    %c0_i32 = arith.constant 0 : i32
    %c0_i32_0 = arith.constant 0 : i32
    %c0_i32_1 = arith.constant 0 : i32
    return %c0_i32, %c0_i32_0 : i32, i32
  }
  func.func @transform_3(%arg0: i32) -> (i32, i32) {
    %c0_i32 = arith.constant 0 : i32
    %c0_i32_0 = arith.constant 0 : i32
    %c0_i32_1 = arith.constant 0 : i32
    return %c0_i32, %c0_i32_0 : i32, i32
  }
  func.func @transform_4(%arg0: i32) -> (i32, i32) {
    %c0_i32 = arith.constant 0 : i32
    %c0_i32_0 = arith.constant 0 : i32
    %c0_i32_1 = arith.constant 0 : i32
    return %c0_i32, %c0_i32_0 : i32, i32
  }
  func.func @transform_5(%arg0: i32) -> (i32, i32) {
    %c0_i32 = arith.constant 0 : i32
    %c0_i32_0 = arith.constant 0 : i32
    %c0_i32_1 = arith.constant 0 : i32
    return %c0_i32, %c0_i32_0 : i32, i32
  }
  func.func @transform_6(%arg0: i32) -> (i32, i32) {
    %c0_i32 = arith.constant 0 : i32
    %c0_i32_0 = arith.constant 0 : i32
    %c0_i32_1 = arith.constant 0 : i32
    return %c0_i32, %c0_i32_0 : i32, i32
  }
  func.func @transform_7(%arg0: i32) -> (i32, i32) {
    %c0_i32 = arith.constant 0 : i32
    %c0_i32_0 = arith.constant 0 : i32
    %c0_i32_1 = arith.constant 0 : i32
    return %c0_i32, %c0_i32_0 : i32, i32
  }
  func.func @transform_8(%arg0: i32) -> (i32, i32) {
    %c0_i32 = arith.constant 0 : i32
    %c0_i32_0 = arith.constant 0 : i32
    %c0_i32_1 = arith.constant 0 : i32
    return %c0_i32, %c0_i32_0 : i32, i32
  }
  func.func @transform_9(%arg0: i32) -> (i32, i32) {
    %c0_i32 = arith.constant 0 : i32
    %c0_i32_0 = arith.constant 0 : i32
    %c0_i32_1 = arith.constant 0 : i32
    return %c0_i32, %c0_i32_0 : i32, i32
  }
  func.func @transform_10(%arg0: i32) -> (i32, i32) {
    %c0_i32 = arith.constant 0 : i32
    %c0_i32_0 = arith.constant 0 : i32
    %c0_i32_1 = arith.constant 0 : i32
    return %c0_i32, %c0_i32_0 : i32, i32
  }
  func.func @transform_11(%arg0: i32) -> (i32, i32) {
    %c0_i32 = arith.constant 0 : i32
    %c0_i32_0 = arith.constant 0 : i32
    %c0_i32_1 = arith.constant 0 : i32
    return %c0_i32, %c0_i32_0 : i32, i32
  }
  func.func @transform_12(%arg0: i32) -> (i32, i32) {
    %c0_i32 = arith.constant 0 : i32
    %c0_i32_0 = arith.constant 0 : i32
    %c0_i32_1 = arith.constant 0 : i32
    return %c0_i32, %c0_i32_0 : i32, i32
  }
  func.func @transform_13(%arg0: i32) -> (i32, i32) {
    %c0_i32 = arith.constant 0 : i32
    %c0_i32_0 = arith.constant 0 : i32
    %c0_i32_1 = arith.constant 0 : i32
    return %c0_i32, %c0_i32_0 : i32, i32
  }
  func.func @transform_14(%arg0: i32) -> (i32, i32) {
    %c0_i32 = arith.constant 0 : i32
    %c0_i32_0 = arith.constant 0 : i32
    %c0_i32_1 = arith.constant 0 : i32
    return %c0_i32, %c0_i32_0 : i32, i32
  }
  func.func @transform_15(%arg0: i32) -> (i32, i32) {
    %c0_i32 = arith.constant 0 : i32
    %c0_i32_0 = arith.constant 0 : i32
    %c0_i32_1 = arith.constant 0 : i32
    return %c0_i32, %c0_i32_0 : i32, i32
  }
  func.func @transform_16(%arg0: i32) -> (i32, i32) {
    %c0_i32 = arith.constant 0 : i32
    %c0_i32_0 = arith.constant 0 : i32
    %c0_i32_1 = arith.constant 0 : i32
    return %c0_i32, %c0_i32_0 : i32, i32
  }
  func.func @transform_17(%arg0: i32) -> (i32, i32) {
    %c0_i32 = arith.constant 0 : i32
    %c0_i32_0 = arith.constant 0 : i32
    %c0_i32_1 = arith.constant 0 : i32
    return %c0_i32, %c0_i32_0 : i32, i32
  }
  func.func @transform_18(%arg0: i32) -> (i32, i32) {
    %c0_i32 = arith.constant 0 : i32
    %c0_i32_0 = arith.constant 0 : i32
    %c0_i32_1 = arith.constant 0 : i32
    return %c0_i32, %c0_i32_0 : i32, i32
  }
  func.func @transform_19(%arg0: i32) -> (i32, i32, i32) {
    %c0_i32 = arith.constant 0 : i32
    %c0_i32_0 = arith.constant 0 : i32
    %c0_i32_1 = arith.constant 0 : i32
    return %arg0, %c0_i32, %c0_i32_0 : i32, i32, i32
  }
}

</mosaic_0001>

<bundles_post_ra>
// kernel: tpu_custom_call.1
= control target key start
LH: loop header
LB: loop body
LE: loop exit
PB: predicated region body
PF: predicated region fallthrough
CT: control target
= control target key end

     0   :  { %s4275_s0 = inlined_call_operand.hbm [shape: f32[2,8,128], index: 0, kind: input, shape index: {}]   ;;  %s4276_s1 = inlined_call_operand.hbm [shape: f32[2,16,128], index: 1, kind: input, shape index: {}]   ;;  %s4277_s2 = inlined_call_operand.vmem [shape: f32[1,128], index: 2, kind: input, shape index: {}]   ;;  %s4278_s3 = inlined_call_operand.vmem [shape: f32[1,128], index: 3, kind: input, shape index: {}]   ;;  %s4279_s4 = inlined_call_operand.vmem [shape: f32[1,128], index: 4, kind: input, shape index: {}]   ;;  %s4280_s5 = inlined_call_operand.vmem [shape: f32[1,128], index: 5, kind: input, shape index: {}]   ;;  %s4281_s6 = inlined_call_operand.hbm [shape: f32[128,128], index: 6, kind: input, shape index: {}]   ;;  %s4282_s7 = inlined_call_operand.hbm [shape: f32[128,128], index: 7, kind: input, shape index: {}]   ;;  %s4283_s8 = inlined_call_operand.hbm [shape: f32[128,128], index: 8, kind: input, shape index: {}]   ;;  %s4284_s9 = inlined_call_operand.hbm [shape: f32[128,128], index: 9, kind: input, shape index: {}]   ;;  %s4285_s10 = inlined_call_operand.vmem [shape: f32[1,128], index: 10, kind: input, shape index: {}]   ;;  %s4286_s11 = inlined_call_operand.vmem [shape: f32[1,128], index: 11, kind: input, shape index: {}]   ;;  %s4287_s12 = inlined_call_operand.vmem [shape: f32[1,128], index: 12, kind: input, shape index: {}]   ;;  %s4288_s13 = inlined_call_operand.hbm [shape: f32[128,128], index: 13, kind: input, shape index: {}]   ;;  %s4289_s14 = inlined_call_operand.hbm [shape: f32[128,128], index: 14, kind: input, shape index: {}]   ;;  %s4290_s15 = inlined_call_operand.vmem [shape: f32[1,128], index: 15, kind: input, shape index: {}]   ;;  %s4291_s16 = inlined_call_operand.vmem [shape: f32[1,128], index: 16, kind: input, shape index: {}]   ;;  %s4292_s17 = inlined_call_operand.hbm [shape: f32[128,128], index: 17, kind: input, shape index: {}]   ;;  %s4293_s18 = inlined_call_operand.vmem [shape: f32[1,128], index: 18, kind: input, shape index: {}]   ;;  %s4294_s19 = inlined_call_operand.hbm [shape: f32[2,8,128], index: 19, kind: output, shape index: {}]  }
   0x1   :  { %4308 = sst [smem:[#allocation28_spill]] %s4275_s0 }
   0x2   :  { %4309 = sst [smem:[#allocation29_spill]] %s4276_s1 }
   0x3   :  { %4310 = sst [smem:[#allocation30_spill]] %s4277_s2 }
   0x4   :  { %4311 = sst [smem:[#allocation31_spill]] %s4278_s3 }
   0x5   :  { %4312 = sst [smem:[#allocation32_spill]] %s4281_s6 }
   0x6   :  { %4313 = sst [smem:[#allocation33_spill]] %s4282_s7 }
   0x7   :  { %4314 = sst [smem:[#allocation34_spill]] %s4283_s8 }
   0x8   :  { %4315 = sst [smem:[#allocation35_spill]] %s4284_s9 }
   0x9   :  { %4316 = sst [smem:[#allocation36_spill]] %s4288_s13 }
   0xa   :  { %4317 = sst [smem:[#allocation37_spill]] %s4289_s14 }
   0xb   :  { %4318 = sst [smem:[#allocation38_spill]] %s4292_s17 }
   0xc   :  { %4319 = sst [smem:[#allocation39_spill]] %s4293_s18 }
   0xd   :  { %4320 = sst [smem:[#allocation40_spill]] %s4294_s19 }
   0xe   :  { %24 = vsyncpa [#allocation3], 0 }
   0xf   :  { %26 = vsyncpa [#allocation3 + $0x1], 0 }
  0x10   :  { %27 = vsyncpa [#allocation6], 0 }
  0x11   :  { %29 = vsyncpa [#allocation6 + $0x1], 0 }
  0x12   :  { %30 = vsyncpa [#allocation9], 0 }
  0x13   :  { %31 = vsyncpa [#allocation12], 0 }
  0x14   :  { %32 = vsyncpa [#allocation15], 0 }
  0x15   :  { %33 = vsyncpa [#allocation4], 0 }
  0x16   :  { %35 = vsyncpa [#allocation4 + $0x1], 0  ;;  %s3710_s0 = smov 0   ;;  %s3712_s30 = smov 0  }
  0x17   :  { %s3714_s20 = smov 0   ;;  %s3716_s21 = smov 0  }
  0x18 LB: > { %4321 = sst [smem:[#allocation25_spill]] %s3587_s20  ;;  %s3593_s1 = smov [#allocation7]   ;;  %s3591_s21 = sphi %s3716_s21, %s4360_s21   ;;  %s3587_s20 = sphi %s3714_s20, %s4362_s20   ;;  %s3583_s30 = sphi %s3712_s30, %s4364_s30   ;;  %s3579_s0 = sphi %s3710_s0, %s4363_s0  }
  0x19   : > { %s505_s22 = sshll.u32 %s3593_s1, 4  ;;  %s3731_s2 = sadd.s32 4294967295, %s3591_s21   ;;  %s506_s22 = int_to_ptr.vmem [resolvable:$true] %s505_s22 }
  0x1a   : > { %p2596_p0 = scmp.ge.s32.totalorder %s3591_s21, 1  ;;  %p4300_p1 = scmp.eq.s32.totalorder %s3731_s2, 0 }
  0x1b   : > { %p481_p2 = scmp.lt.s32.totalorder %s3591_s21, 3  ;;  %s3594_s24 = smov [#allocation8]  }
  0x1c   : > { %s518_s25 = sshll.u32 %s3594_s24, 4  ;;  %s3595_s26 = smov [#allocation11]   ;;  %s3749_s25 = int_to_ptr.vmem [resolvable:$true] %s518_s25 }
  0x1d   : > { %p3736_p3 = pnand %p2596_p0, %p481_p2  ;;  %s544_s27 = sshll.u32 %s3595_s26, 4  ;;  %s3751_s27 = int_to_ptr.vmem [resolvable:$true] %s544_s27 }
  0x1e   : > { %s3280_s29 = scalar_lea.vmem %s506_s22, 2048  ;;  %p3288_p11 = scmp.lt.s32.totalorder %s506_s22, %s506_s22 }
  0x1f   : > { %s4322_s23 = scalar_select %p3736_p3, 1, 0 }
  0x20   : > { %p3148_p5 = pneg %p3736_p3  ;;  %p3281_p8 = scmp.ne.s32.totalorder %s506_s22, %s3280_s29 }
  0x21   : > { %p3289_p12 = scmp.lt.s32.totalorder %s3280_s29, %s3280_s29 }
  0x22   : > { %p3745_p6 = pnand %p3148_p5, %p4300_p1 }
  0x23   : > { %p3290_p13 = por %p3289_p12, %p3288_p11 }
  0x24   : > { %p3755_p7 = pneg %p3745_p6 }
  0x26   : > { %p3283_p9 = pnand %p3281_p8, %p3755_p7 }
  0x28   : > { %p3284_p10 = pneg %p3283_p9 }
  0x2a   : > { %p3291_p0 = pnand %p3290_p13, %p3284_p10 }
  0x2c   : > { %3294 = shalt.err (!%p3291_p0)
}
  0x2d   : > { %s4298_s1 = smov 128   ;;  %s4299_s24 = smov 8  }
  0x2e   : > { %s4325_s6 = sld [smem:[#allocation32_spill]]  ;;  %s3306_s18 = scalar_lea.vmem %s3749_s25, 2048 }
  0x2f   : > { %p3307_p2 = scmp.ne.s32.totalorder %s3749_s25, %s3306_s18  ;;  %p3314_p9 = scmp.lt.s32.totalorder %s3749_s25, %s3749_s25 }
  0x30   : > { %p3315_p10 = scmp.lt.s32.totalorder %s3306_s18, %s3306_s18 }
  0x31   : > { %p3309_p5 = pnand %p3307_p2, %p3755_p7 }
  0x32   : > { %p3316_p11 = por %p3315_p10, %p3314_p9 }
  0x33   : > { %p3310_p8 = pneg %p3309_p5 }
  0x34   : > { %3151 = dma.hbm_to_vmem [thread:$0]  (!%p3745_p6), %s4325_s6, 2048, %s506_s22, [#allocation6], %s4298_s1, %s4298_s1, %s4299_s24  }
  0x35   : > { %p3317_p12 = pnand %p3316_p11, %p3310_p8 }
  0x37   : > { %3320 = shalt.err (!%p3317_p12)
}
  0x38   : > { %s4326_s7 = sld [smem:[#allocation33_spill]]  ;;  %s3332_s22 = scalar_lea.vmem %s3751_s27, 2048 }
  0x39   : > { %p3333_p13 = scmp.ne.s32.totalorder %s3751_s27, %s3332_s22  ;;  %p3340_p5 = scmp.lt.s32.totalorder %s3751_s27, %s3751_s27 }
  0x3a   : > { %p3341_p8 = scmp.lt.s32.totalorder %s3332_s22, %s3332_s22 }
  0x3b   : > { %p3335_p0 = pnand %p3333_p13, %p3755_p7 }
  0x3c   : > { %p3342_p9 = por %p3341_p8, %p3340_p5 }
  0x3d   : > { %p3336_p2 = pneg %p3335_p0 }
  0x3e   : > { %3154 = dma.hbm_to_vmem [thread:$0]  (!%p3745_p6), %s4326_s7, 2048, %s3749_s25, [#allocation9], %s4298_s1, %s4298_s1, %s4299_s24  }
  0x3f   : > { %p3343_p10 = pnand %p3342_p9, %p3336_p2 }
  0x41   : > { %3346 = shalt.err (!%p3343_p10)
}
  0x42   : > { %s4327_s9 = sld [smem:[#allocation35_spill]]  ;;  %s3598_s25 = smov [#allocation14]  }
  0x43   : > { %s579_s29 = sshll.u32 %s3598_s25, 4  ;;  %s3599_s19 = smov [#allocation10]   ;;  %s580_s29 = int_to_ptr.vmem [resolvable:$true] %s579_s29 }
  0x44   : > { %s531_s6 = sshll.u32 %s3599_s19, 4  ;;  %s3358_s22 = scalar_lea.vmem %s580_s29, 2048  ;;  %s532_s6 = int_to_ptr.vmem [resolvable:$true] %s531_s6 }
  0x45   : > { %p3359_p11 = scmp.ne.s32.totalorder %s580_s29, %s3358_s22  ;;  %p3366_p0 = scmp.lt.s32.totalorder %s580_s29, %s580_s29 }
  0x46   : > { %p3367_p2 = scmp.lt.s32.totalorder %s3358_s22, %s3358_s22 }
  0x47   : > { %p3361_p12 = pnand %p3359_p11, %p3755_p7 }
  0x48   : > { %3160 = dma.hbm_to_vmem [thread:$0]  (!%p3745_p6), %s4327_s9, 2048, %s3751_s27, [#allocation12], %s4298_s1, %s4298_s1, %s4299_s24  }
  0x49   : > { %p3362_p13 = pneg %p3361_p12  ;;  %p3368_p5 = por %p3367_p2, %p3366_p0 }
  0x4b   : > { %p3369_p8 = pnand %p3368_p5, %p3362_p13 }
  0x4d   : > { %3372 = shalt.err (!%p3369_p8)
}
  0x4e   : > { %s4328_s14 = sld [smem:[#allocation37_spill]]  ;;  %s3384_s26 = scalar_lea.vmem %s532_s6, 2048 }
  0x4f   : > { %p3385_p9 = scmp.ne.s32.totalorder %s532_s6, %s3384_s26  ;;  %p3392_p12 = scmp.lt.s32.totalorder %s532_s6, %s532_s6 }
  0x50   : > { %p3393_p0 = scmp.lt.s32.totalorder %s3384_s26, %s3384_s26 }
  0x51   : > { %p3387_p10 = pnand %p3385_p9, %p3755_p7 }
  0x52   : > { %p3394_p13 = por %p3393_p0, %p3392_p12 }
  0x53   : > { %p3388_p11 = pneg %p3387_p10 }
  0x54   : > { %3166 = dma.hbm_to_vmem [thread:$0]  (!%p3745_p6), %s4328_s14, 2048, %s580_s29, [#allocation15], %s4298_s1, %s4298_s1, %s4299_s24  }
  0x55   : > { %p3395_p2 = pnand %p3394_p13, %p3388_p11 }
  0x57   : > { %3398 = shalt.err (!%p3395_p2)
}
  0x58   : > { %s4329_s8 = sld [smem:[#allocation34_spill]]  ;;  %s3600_s29 = smov [#allocation13]  }
  0x59   : > { %s566_s22 = sshll.u32 %s3600_s29, 4  ;;  %s3601_s27 = smov [#allocation16]   ;;  %s567_s22 = int_to_ptr.vmem [resolvable:$true] %s566_s22 }
  0x5a   : > { %s598_s18 = sshll.u32 %s3601_s27, 4  ;;  %s3410_s7 = scalar_lea.vmem %s567_s22, 2048  ;;  %s599_s18 = int_to_ptr.vmem [resolvable:$true] %s598_s18 }
  0x5b   : > { %p3411_p5 = scmp.ne.s32.totalorder %s567_s22, %s3410_s7  ;;  %p3418_p10 = scmp.lt.s32.totalorder %s567_s22, %s567_s22 }
  0x5c   : > { %p3419_p11 = scmp.lt.s32.totalorder %s3410_s7, %s3410_s7 }
  0x5d   : > { %p3413_p8 = pnand %p3411_p5, %p3755_p7 }
  0x5e   : > { %3157 = dma.hbm_to_vmem [thread:$0]  (!%p3745_p6), %s4329_s8, 2048, %s532_s6, [#allocation9], %s4298_s1, %s4298_s1, %s4299_s24  }
  0x5f   : > { %p3414_p9 = pneg %p3413_p8  ;;  %p3420_p12 = por %p3419_p11, %p3418_p10 }
  0x61   : > { %p3421_p0 = pnand %p3420_p12, %p3414_p9 }
  0x63   : > { %3424 = shalt.err (!%p3421_p0)
}
  0x64   : > { %s4330_s13 = sld [smem:[#allocation36_spill]]  ;;  %s3436_s25 = scalar_lea.vmem %s599_s18, 2048 }
  0x65   : > { %p3437_p13 = scmp.ne.s32.totalorder %s599_s18, %s3436_s25  ;;  %p3444_p8 = scmp.lt.s32.totalorder %s599_s18, %s599_s18 }
  0x66   : > { %p3445_p10 = scmp.lt.s32.totalorder %s3436_s25, %s3436_s25 }
  0x67   : > { %p3439_p2 = pnand %p3437_p13, %p3755_p7 }
  0x68   : > { %p3446_p9 = por %p3445_p10, %p3444_p8 }
  0x69   : > { %p3440_p5 = pneg %p3439_p2 }
  0x6a   : > { %3163 = dma.hbm_to_vmem [thread:$0]  (!%p3745_p6), %s4330_s13, 2048, %s567_s22, [#allocation12], %s4298_s1, %s4298_s1, %s4299_s24  }
  0x6b   : > { %p3447_p11 = pnand %p3446_p9, %p3440_p5 }
  0x6d   : > { %3450 = shalt.err (!%p3447_p11)
}
  0x6e   : > { %s4331_s17 = sld [smem:[#allocation38_spill]]  ;;  %s2595_s3 = sadd.s32 4294967294, %s3591_s21  }
  0x6f   : > { %s3841_s28 = sadd.s32 1, %s3591_s21   ;;  %s48_s29 = sadd.s32 1, %s3587_s20 }
  0x70   : > { %4332 = sst [smem:[#allocation26_spill]] %s3841_s28  ;;  %s45_s22 = ssub.s32 %s3591_s21, %s3841_s28 }
  0x71   : > { %p55_p7 = scmp.ne.s32.totalorder %s3587_s20, %s3583_s30  ;;  %p46_p12 = scmp.eq.s32.totalorder %s45_s22, 0 }
  0x72   : > { %p56_p0 = scmp.eq.s32.totalorder %s3591_s21, 0  ;;  %p61_p13 = scmp.ne.s32.totalorder %s3583_s30, %s3579_s0 }
  0x73   : > { %p468_p2 = scmp.eq.s32.totalorder %s3731_s2, 1  ;;  %p474_p10 = scmp.eq.s32.totalorder %s2595_s3, 1 }
  0x74   : > { %3169 = dma.hbm_to_vmem [thread:$0]  (!%p3745_p6), %s4331_s17, 2048, %s599_s18, [#allocation15], %s4298_s1, %s4298_s1, %s4299_s24  }
  0x75   : > { %s3853_s27 = scalar_select %p46_p12, %s3587_s20, %s48_s29  }
  0x76   : > { %p57_p5 = por %p56_p0, %p55_p7  ;;  %p3857_p8 = por %p4300_p1, %p61_p13 }
  0x77   : > { %4333 = sst [smem:[#allocation27_spill]] %s3853_s27  ;;  %p3861_p6 = por %p468_p2, %p55_p7 }
  0x78   : > { %s4334_s6 = scalar_select %p3857_p8, 1, 0 }
  0x79   : > { %s4335_s18 = scalar_select %p3861_p6, 1, 0 }
  0x7a   : > { %p3188_p9 = scmp.lt.s32.totalorder %s3591_s21, 2  ;;  %s3867_s26 = sand.u32 1, %s3587_s20  }
  0x7b   : > { %p3869_p11 = por %p474_p10, %p61_p13  ;;  %s2605_s7 = sshll.u32 %s3867_s26, 3 }
  0x7c   : > { %s2606_s19 = sshll.u32 %s3591_s21, 7  ;;  %s4337_s1 = sld [smem:[#allocation28_spill]] }
  0x7d   : > { %s4336_s25 = scalar_select %p3869_p11, 1, 0 }
  0x7e   : > { %s619_s3 = scalar_lea.vmem [#allocation2], %s2605_s7  ;;  %p3880_p7 = pnand %p3188_p9, %p57_p5 }
  0x7f   : > { %s626_s8 = sshll.u32 %s619_s3, 4  ;;  %s2607_s13 = sshll.u32 %s3867_s26, 4  ;;  %s627_s8 = int_to_ptr.vmem [resolvable:$true] %s626_s8 }
  0x80   : > { %s616_s14 = scalar_lea.sflag [#allocation3], %s3867_s26  ;;  %p3453_p0 = pneg %p3880_p7 }
  0x82   : > { %s3878_s24 = scalar_lea.hbm %s4337_s1, %s2606_s19  ;;  %s3456_s29 = scalar_lea.hbm %s4337_s1, 256 }
  0x83   : > { %s3451_s17 = scalar_lea.hbm %s3878_s24, 128  ;;  %p3457_p5 = scmp.lt.s32.totalorder %s3878_s24, %s4337_s1 }
  0x84   : > { %p3452_p12 = scmp.ne.s32.totalorder %s3878_s24, %s3451_s17  ;;  %p3458_p10 = scmp.lt.s32.totalorder %s3456_s29, %s3451_s17 }
  0x86   : > { %p3454_p13 = pnand %p3453_p0, %p3452_p12  ;;  %p3459_p9 = por %p3458_p10, %p3457_p5 }
  0x88   : > { %p3455_p2 = pneg %p3454_p13 }
  0x8a   : > { %p3460_p4 = pnand %p3459_p9, %p3455_p2 }
  0x8c   : > { %3463 = shalt.err (!%p3460_p4)
}
  0x8d   : > { %s3464_s26 = scalar_lea.vmem %s627_s8, 128  ;;  %s3602_s27 = smov [#allocation2]  }
  0x8e   : > { %p3465_p1 = scmp.ne.s32.totalorder %s627_s8, %s3464_s26  ;;  %s3469_s20 = sshll.u32 %s3602_s27, 4  ;;  %s3470_s20 = int_to_ptr.vmem [resolvable:$false] %s3469_s20 }
  0x8f   : > { %s3471_s19 = scalar_lea.vmem %s3470_s20, 256  ;;  %p3472_p13 = scmp.lt.s32.totalorder %s627_s8, %s3470_s20 }
  0x90   : > { %p3467_p11 = pnand %p3465_p1, %p3453_p0  ;;  %p3473_p6 = scmp.lt.s32.totalorder %s3471_s19, %s3464_s26 }
  0x92   : > { %p3468_p12 = pneg %p3467_p11  ;;  %p3474_p8 = por %p3473_p6, %p3472_p13 }
  0x94   : > { %p3475_p3 = pnand %p3474_p8, %p3468_p12 }
  0x96   : > { %3478 = shalt.err (!%p3475_p3)
}
  0x97   : > { %3173 = dma.hbm_to_vmem [thread:$0]  (!%p3880_p7), %s3878_s24, 128, %s627_s8, %s616_s14  }
  0x98   : > { %s637_s17 = scalar_lea.vmem [#allocation5], %s2607_s13  ;;  %s633_s29 = sand.u32 1, %s3591_s21  }
  0x99   : > { %s644_s7 = sshll.u32 %s637_s17, 4  ;;  %s2655_s27 = sshll.u32 %s3591_s21, 8  ;;  %s3907_s7 = int_to_ptr.vmem [resolvable:$true] %s644_s7 }
  0x9a   : > { %s4339_s20 = sld [smem:[#allocation29_spill]]  ;;  %s634_s19 = scalar_lea.sflag [#allocation6], %s633_s29 }
  0xa0   : > { %s4340_s1 = smov %s4339_s20  ;;  %s3913_s26 = scalar_lea.hbm %s4339_s20, %s2655_s27 }
  0xa1   : > { %s3479_s28 = scalar_lea.hbm %s3913_s26, 256  ;;  %s3484_s14 = scalar_lea.hbm %s4340_s1, 512 }
  0xa2   : > { %p3480_p1 = scmp.ne.s32.totalorder %s3913_s26, %s3479_s28  ;;  %p3485_p8 = scmp.lt.s32.totalorder %s3913_s26, %s4340_s1 }
  0xa3   : > { %p3486_p6 = scmp.lt.s32.totalorder %s3484_s14, %s3479_s28 }
  0xa4   : > { %p3482_p3 = pnand %p3480_p1, %p3453_p0 }
  0xa5   : > { %p3487_p11 = por %p3486_p6, %p3485_p8 }
  0xa6   : > { %p3483_p4 = pneg %p3482_p3 }
  0xa8   : > { %p3488_p2 = pnand %p3487_p11, %p3483_p4 }
  0xaa   : > { %3491 = shalt.err (!%p3488_p2)
}
  0xab   : > { %s3492_s29 = scalar_lea.vmem %s3907_s7, 256  ;;  %s3603_s27 = smov [#allocation5]  }
  0xac   : > { %p3493_p5 = scmp.ne.s32.totalorder %s3907_s7, %s3492_s29  ;;  %s3497_s22 = sshll.u32 %s3603_s27, 4  ;;  %s3498_s22 = int_to_ptr.vmem [resolvable:$false] %s3497_s22 }
  0xad   : > { %s3499_s3 = scalar_lea.vmem %s3498_s22, 512  ;;  %p3500_p12 = scmp.lt.s32.totalorder %s3907_s7, %s3498_s22 }
  0xae   : > { %p3495_p10 = pnand %p3493_p5, %p3453_p0  ;;  %p3501_p13 = scmp.lt.s32.totalorder %s3499_s3, %s3492_s29 }
  0xb0   : > { %p3496_p9 = pneg %p3495_p10  ;;  %p3502_p1 = por %p3501_p13, %p3500_p12 }
  0xb2   : > { %p3503_p3 = pnand %p3502_p1, %p3496_p9 }
  0xb4   : > { %3506 = shalt.err (!%p3503_p3)
}
  0xb5   : > { %s4341_s28 = smov 8   ;;  %s4342_s20 = smov 128  }
  0xb6   : > { %3176 = dma.hbm_to_vmem [thread:$0]  (!%p3880_p7), %s3913_s26, 256, %s3907_s7, %s634_s19, %s4342_s20, %s4342_s20, %s4341_s28  }
  0xb7   : > { %p4343_p0 = scmp.ne.s32.totalorder %s4322_s23, 0 }
  0xb8   : > { %s3943_s8 = sand.u32 (!%p4343_p0), 1, %s3583_s30   ;;  %p4344_p4 = scmp.ne.s32.totalorder (!%p4343_p0), %s4334_s6, 0 }
  0xb9   : > { %656 = sbr.rel (%p4343_p0) target bundleno = 3695 (0xe6f), region = 96  ;;  %s2611_s13 = sshll.u32 (!%p4343_p0), %s3943_s8, 3 }
  0xba   : > { %s659_s14 = scalar_lea.sflag (!%p4343_p0), [#allocation3], %s3943_s8  ;;  %s662_s9 = scalar_lea.vmem (!%p4343_p0), [#allocation2], %s2611_s13 }
  0xbe   : > { %3550 = dma.done.wait (%p4344_p4), %s659_s14, 128  }
  0xbf   : > { %3552 = vsyncadd (%p4344_p4), %s659_s14, 4294967168  ;;  %s667_s23 = sand.u32 1, %s3731_s2   ;;  %s2612_s7 = sshll.u32 %s3943_s8, 4 }
  0xc0   : > { %s668_s26 = scalar_lea.sflag [#allocation6], %s667_s23  ;;  %s671_s19 = scalar_lea.vmem [#allocation5], %s2612_s7 }
  0xc1   : > { %3554 = dma.done.wait (%p4344_p4), %s668_s26, 256  }
  0xc2   : > { %3556 = vsyncadd (%p4344_p4), %s668_s26, 4294967040  ;;  %p4345_p7 = scmp.eq.s32.totalorder %s3731_s2, 0 }
  0xc4   : > { %3558 = dma.done.wait (%p4345_p7), [#allocation6], 2048   ;;  %p4346_p8 = pmov %p4345_p7 }
  0xc5   : > { %p4347_p6 = pmov %p4345_p7 }
  0xc6   : > { %3560 = vsyncadd (%p4346_p8), [#allocation6], 4294965248 }
  0xc7   : > { %3562 = dma.done.wait (%p4347_p6), [#allocation9], 4096   ;;  %p4348_p11 = pmov %p4347_p6 }
  0xc8   : > { %p4349_p2 = pmov %p4347_p6 }
  0xc9   : > { %3564 = vsyncadd (%p4348_p11), [#allocation9], 4294963200 }
  0xca   : > { %3566 = dma.done.wait (%p4349_p2), [#allocation12], 4096   ;;  %p4350_p5 = pmov %p4349_p2 }
  0xcb   : > { %p4351_p10 = pmov %p4349_p2 }
  0xcc   : > { %3568 = vsyncadd (%p4350_p5), [#allocation12], 4294963200 }
  0xcd   : > { %3570 = dma.done.wait (%p4351_p10), [#allocation15], 4096   ;;  %p4352_p9 = pmov %p4349_p2 }
  0xce   : > { %v760_v0 = vld [vmem:[%s671_s19] sm:$0xff]  ;;  %v759_v1 = vld [vmem:[%s662_s9] sm:$0xff]  ;;  %v3604_v5 = vmov 0.0   ;;  %v843_v20 = vld [vmem:[#allocation7 + $0x68] sm:$0xff]  ;;  %vm3605_vm0 = vmmov 0   ;;  %s4353_s3 = sld [smem:[#allocation30_spill]] }
  0xcf   : > { %3572 = vsyncadd (%p4352_p9), [#allocation15], 4294963200  ;;  %792 = vadd.xlane.f32.xlu0 %v760_v0  ;;  %764 = vadd.xlane.f32.xlu1 %v759_v1  ;;  %v761_v2 = vld [vmem:[%s671_s19 + $0x8] sm:$0xff]  ;;  %v844_v6 = vld [vmem:[#allocation7 + $0x70] sm:$0xff]  ;;  %s4354_s14 = sld [smem:[#allocation31_spill]]  ;;  %vm1098_vm1 = vcmask 261120  }
  0xd0   : > { %v845_v3 = vld [vmem:[#allocation7 + $0x78] sm:$0xff]  ;;  %2804 = vmatprep.subr.mxu0 %v3604_v5  ;;  %v930_v7 = vld [vmem:[#allocation8 + $0x70] sm:$0xff]  ;;  %v929_v21 = vld [vmem:[#allocation8 + $0x68] sm:$0xff]  ;;  %2836 = vmatprep.mubr.msk.f32.mxu0 %vm3605_vm0, %v3604_v5  ;;  %s3606_s9 = smov 96   ;;  %vm1179_vm2 = vcmask 130048   ;;  %s3607_s23 = smov 64  }
  0xd1   : > { %v931_v4 = vld [vmem:[#allocation8 + $0x78] sm:$0xff]  ;;  %2805 = vmatpush3.msra.mxu0 %v845_v3  ;;  %v842_v22 = vld [vmem:[#allocation7 + $0x60] sm:$0xff]  ;;  %v840_v26 = vld [vmem:[#allocation7 + $0x50] sm:$0xff]  ;;  %s3608_s7 = smov 32   ;;  %s4356_s24 = sld [smem:[#allocation40_spill]] }
  0xd2   : > { %2839 = vmatprep.subr.mxu1 %v931_v4  ;;  %2806 = vmatprep.subr.mxu0 %v3604_v5  ;;  %v928_v23 = vld [vmem:[#allocation8 + $0x60] sm:$0xff]  ;;  %v841_v24 = vld [vmem:[#allocation7 + $0x58] sm:$0xff]  ;;  %v926_v27 = vld [vmem:[#allocation8 + $0x50] sm:$0xff]  ;;  %s2423_s29 = scalar_lea.sflag [#allocation4], %s3943_s8  ;;  %p4357_p13 = scmp.ne.s32.totalorder %s4335_s18, 0 }
  0xd3   : > { %794 = vadd.xlane.f32.xlu0 %v761_v2  ;;  %2840 = vmatpush3.msra.mxu1 %v931_v4  ;;  %v927_v25 = vld [vmem:[#allocation8 + $0x58] sm:$0xff]  ;;  %v839_v28 = vld [vmem:[#allocation7 + $0x48] sm:$0xff]  ;;  %v838_v30 = vld [vmem:[#allocation7 + $0x40] sm:$0xff] }
  0xd4   : > { %2841 = vmatprep.subr.mxu1 %v930_v7  ;;  %2807 = vmatpush3.msra.mxu0 %v844_v6  ;;  %v925_v29 = vld [vmem:[#allocation8 + $0x48] sm:$0xff]  ;;  %v924_v31 = vld [vmem:[#allocation8 + $0x40] sm:$0xff]  ;;  %v837_v32 = vld [vmem:[#allocation7 + $0x38] sm:$0xff] }
  0xd5   : > { %2842 = vmatpush3.msra.mxu1 %v930_v7  ;;  %2808 = vmatprep.subr.mxu0 %v3604_v5  ;;  %v923_v33 = vld [vmem:[#allocation8 + $0x38] sm:$0xff]  ;;  %v836_v34 = vld [vmem:[#allocation7 + $0x30] sm:$0xff]  ;;  %v835_v36 = vld [vmem:[#allocation7 + $0x28] sm:$0xff] }
  0xd6   : > { %2809 = vmatpush3.msra.mxu0 %v843_v20  ;;  %2843 = vmatprep.subr.mxu1 %v929_v21  ;;  %v922_v35 = vld [vmem:[#allocation8 + $0x30] sm:$0xff]  ;;  %v921_v37 = vld [vmem:[#allocation8 + $0x28] sm:$0xff]  ;;  %v834_v38 = vld [vmem:[#allocation7 + $0x20] sm:$0xff] }
  0xd7   : > { %2810 = vmatprep.subr.mxu0 %v3604_v5  ;;  %2844 = vmatpush3.msra.mxu1 %v929_v21  ;;  %v920_v39 = vld [vmem:[#allocation8 + $0x20] sm:$0xff]  ;;  %v833_v40 = vld [vmem:[#allocation7 + $0x18] sm:$0xff]  ;;  %v832_v42 = vld [vmem:[#allocation7 + $0x10] sm:$0xff] }
  0xd8   : > { %2811 = vmatpush3.msra.mxu0 %v842_v22  ;;  %2845 = vmatprep.subr.mxu1 %v928_v23  ;;  %v919_v41 = vld [vmem:[#allocation8 + $0x18] sm:$0xff]  ;;  %v918_v43 = vld [vmem:[#allocation8 + $0x10] sm:$0xff]  ;;  %v831_v44 = vld [vmem:[#allocation7 + $0x8] sm:$0xff] }
  0xd9   : > { %2812 = vmatprep.subr.mxu0 %v3604_v5  ;;  %2846 = vmatpush3.msra.mxu1 %v928_v23  ;;  %v917_v45 = vld [vmem:[#allocation8 + $0x8] sm:$0xff]  ;;  %v830_v46 = vld [vmem:[#allocation7] sm:$0xff]  ;;  %v1022_v48 = vld [vmem:[#allocation10 + $0x78] sm:$0xff] }
  0xda   : > { %2813 = vmatpush3.msra.mxu0 %v841_v24  ;;  %2847 = vmatprep.subr.mxu1 %v927_v25  ;;  %v916_v47 = vld [vmem:[#allocation8] sm:$0xff]  ;;  %v2623_v59 = vld [vmem:[%s4279_s4] ss:$0 sm:$0xff]  ;;  %v1012_v20 = vld [vmem:[#allocation10 + $0x28] sm:$0xff] }
  0xdb   : > { %2814 = vmatprep.subr.mxu0 %v3604_v5  ;;  %2848 = vmatpush3.msra.mxu1 %v927_v25  ;;  %v2624_v61 = vld [vmem:[%s4280_s5] ss:$0 sm:$0xff]  ;;  %v1011_v21 = vld [vmem:[#allocation10 + $0x20] sm:$0xff]  ;;  %v1010_v22 = vld [vmem:[#allocation10 + $0x18] sm:$0xff] }
  0xdc   : > { %2815 = vmatpush3.msra.mxu0 %v840_v26  ;;  %2849 = vmatprep.subr.mxu1 %v926_v27  ;;  %v2621_v3 = vld [vmem:[%s4353_s3] ss:$0 sm:$0xff]  ;;  %v1008_v24 = vld [vmem:[#allocation10 + $0x8] sm:$0xff]  ;;  %v1007_v25 = vld [vmem:[#allocation10] sm:$0xff] }
  0xdd   : > { %2816 = vmatprep.subr.mxu0 %v3604_v5  ;;  %2850 = vmatpush3.msra.mxu1 %v926_v27  ;;  %v2622_v7 = vld [vmem:[%s4354_s14] ss:$0 sm:$0xff] }
  0xde   : > { %2817 = vmatpush3.msra.mxu0 %v839_v28  ;;  %2851 = vmatprep.subr.mxu1 %v925_v29  ;;  %v1009_v23 = vld [vmem:[#allocation10 + $0x10] sm:$0xff] }
  0xdf   : > { %2818 = vmatprep.subr.mxu0 %v3604_v5  ;;  %2852 = vmatpush3.msra.mxu1 %v925_v29 }
  0xe0   : > { %2819 = vmatpush3.msra.mxu0 %v838_v30  ;;  %2853 = vmatprep.subr.mxu1 %v924_v31 }
  0xe1   : > { %2820 = vmatprep.subr.mxu0 %v3604_v5  ;;  %2854 = vmatpush3.msra.mxu1 %v924_v31 }
  0xe2   : > { %2821 = vmatpush3.msra.mxu0 %v837_v32  ;;  %2855 = vmatprep.subr.mxu1 %v923_v33 }
  0xe3   : > { %2822 = vmatprep.subr.mxu0 %v3604_v5  ;;  %2856 = vmatpush3.msra.mxu1 %v923_v33 }
  0xe4   : > { %2823 = vmatpush3.msra.mxu0 %v836_v34  ;;  %2857 = vmatprep.subr.mxu1 %v922_v35 }
  0xe5   : > { %2824 = vmatprep.subr.mxu0 %v3604_v5  ;;  %2858 = vmatpush3.msra.mxu1 %v922_v35 }
  0xe6   : > { %2825 = vmatpush3.msra.mxu0 %v835_v36  ;;  %2859 = vmatprep.subr.mxu1 %v921_v37 }
  0xe7   : > { %2826 = vmatprep.subr.mxu0 %v3604_v5  ;;  %2860 = vmatpush3.msra.mxu1 %v921_v37 }
  0xe8   : > { %2827 = vmatpush3.msra.mxu0 %v834_v38  ;;  %2861 = vmatprep.subr.mxu1 %v920_v39 }
  0xe9   : > { %2828 = vmatprep.subr.mxu0 %v3604_v5  ;;  %2862 = vmatpush3.msra.mxu1 %v920_v39 }
  0xea   : > { %2829 = vmatpush3.msra.mxu0 %v833_v40  ;;  %2863 = vmatprep.subr.mxu1 %v919_v41 }
  0xeb   : > { %2830 = vmatprep.subr.mxu0 %v3604_v5  ;;  %2864 = vmatpush3.msra.mxu1 %v919_v41 }
  0xec   : > { %2831 = vmatpush3.msra.mxu0 %v832_v42  ;;  %2865 = vmatprep.subr.mxu1 %v918_v43 }
  0xed   : > { %2832 = vmatprep.subr.mxu0 %v3604_v5  ;;  %2866 = vmatpush3.msra.mxu1 %v918_v43 }
  0xee   : > { %2833 = vmatpush3.msra.mxu0 %v831_v44  ;;  %2867 = vmatprep.subr.mxu1 %v917_v45 }
  0xef   : > { %2834 = vmatprep.subr.mxu0 %v3604_v5  ;;  %2868 = vmatpush3.msra.mxu1 %v917_v45 }
  0xf0   : > { %2835 = vmatpush3.msra.mxu0 %v830_v46  ;;  %2869 = vmatprep.subr.mxu1 %v916_v47 }
  0xf1   : > { %2870 = vmatpush3.msra.mxu1 %v916_v47  ;;  %2874 = vmatprep.subr.mxu0 %v1022_v48 }
  0xf2   : > { %2923 = vmatprep.subr.mxu1 %v3604_v5 }
 0x158   : > { %v793_v8 = vpop.xlane.xlu0 %792  ;;  %v765_v9 = vpop.xlane.xlu1 %764 }
 0x159   : > { %v796_v10 = vmul.f32 0.0078125, %v793_v8  ;;  %v767_v11 = vmul.f32 0.0078125, %v765_v9 }
 0x15b   : > { %v3978_v12 = vsub.f32 %v760_v0, %v796_v10  ;;  %v3980_v13 = vsub.f32 %v759_v1, %v767_v11  ;;  %v1021_v11 = vld [vmem:[#allocation10 + $0x70] sm:$0xff] }
 0x15c   : > { %v795_v14 = vpop.xlane.xlu0 %794 }
 0x15d   : > { %v797_v15 = vmul.f32 0.0078125, %v795_v14  ;;  %v800_v16 = vmul.f32 %v3978_v12, %v3978_v12  ;;  %v769_v18 = vmul.f32 %v3980_v13, %v3980_v13  ;;  %v1018_v14 = vld [vmem:[#allocation10 + $0x58] sm:$0xff] }
 0x15f   : > { %v3984_v17 = vsub.f32 %v761_v2, %v797_v15  ;;  %802 = vadd.xlane.f32.xlu1 %v800_v16  ;;  %v1017_v15 = vld [vmem:[#allocation10 + $0x50] sm:$0xff]  ;;  %v1016_v16 = vld [vmem:[#allocation10 + $0x48] sm:$0xff] }
 0x161   : > { %v801_v19 = vmul.f32 %v3984_v17, %v3984_v17 }
 0x163   : > { %804 = vadd.xlane.f32.xlu0 %v801_v19  ;;  %770 = vadd.xlane.f32.xlu1 %v769_v18  ;;  %v1014_v18 = vld [vmem:[#allocation10 + $0x38] sm:$0xff]  ;;  %v1013_v19 = vld [vmem:[#allocation10 + $0x30] sm:$0xff] }
 0x1e8   : > { %v803_v49 = vpop.xlane.xlu1 %802 }
 0x1e9   : > { %v806_v50 = vmul.f32 0.0078125, %v803_v49 }
 0x1eb   : > { %v808_v51 = vadd.f32 1e-05, %v806_v50 }
 0x1ec   : > { %v805_v52 = vpop.xlane.xlu0 %804  ;;  %v771_v53 = vpop.xlane.xlu1 %770 }
 0x1ed   : > { %3243 = vrsqrt.f32 %v808_v51  ;;  %v807_v54 = vmul.f32 0.0078125, %v805_v52  ;;  %v772_v55 = vmul.f32 0.0078125, %v771_v53  ;;  %v1446_v53 = vld [vmem:[#allocation11 + $0x38] sm:$0xff] }
 0x1ef   : > { %v809_v56 = vadd.f32 1e-05, %v807_v54  ;;  %v773_v57 = vadd.f32 1e-05, %v772_v55  ;;  %v1445_v54 = vld [vmem:[#allocation11 + $0x30] sm:$0xff]  ;;  %v1444_v55 = vld [vmem:[#allocation11 + $0x28] sm:$0xff] }
 0x1f1   : > { %3245 = vrsqrt.f32 %v809_v56  ;;  %v1443_v56 = vld [vmem:[#allocation11 + $0x20] sm:$0xff] }
 0x1f2   : > { %3247 = vrsqrt.f32 %v773_v57 }
 0x1fa   : > { %v3244_v58 = vpop.eup %3243 }
 0x1fb   : > { %v812_v60 = vmul.f32 %v3244_v58, %v3978_v12  ;;  %v1020_v12 = vld [vmem:[#allocation10 + $0x68] sm:$0xff] }
 0x1fd   : > { %v820_v62 = vmul.f32 %v2623_v59, %v812_v60 }
 0x1fe   : > { %v3246_v63 = vpop.eup %3245 }
 0x1ff   : > { %v3248_v0 = vpop.eup %3247  ;;  %v813_v1 = vmul.f32 %v3246_v63, %v3984_v17  ;;  %v828_v2 = vadd.f32 %v2624_v61, %v820_v62  ;;  %v1015_v17 = vld [vmem:[#allocation10 + $0x40] sm:$0xff] }
 0x200   : > { %v775_v4 = vmul.f32 %v3248_v0, %v3980_v13  ;;  %v1019_v13 = vld [vmem:[#allocation10 + $0x60] sm:$0xff] }
 0x201   : > { %v821_v6 = vmul.f32 %v2623_v59, %v813_v1  ;;  %2871 = vmatprep.mubr.f32.mxu1 %v828_v2 }
 0x202   : > { %v782_v8 = vmul.f32 %v2621_v3, %v775_v4 }
 0x203   : > { %v829_v9 = vadd.f32 %v2624_v61, %v821_v6 }
 0x204   : > { %v4021_v10 = vadd.f32 %v2622_v7, %v782_v8  ;;  %v1267_v7 = vld [vmem:[#allocation11 + $0x18] sm:$0xff]  ;;  %v1266_v8 = vld [vmem:[#allocation11 + $0x10] sm:$0xff] }
 0x205   : > { %2872 = vmatmul.mubr.f32.vlgmr.msra.gmra.mxu1 %v829_v9 }
 0x206   : > { %2837 = vmatmul.mubr.f32.vlgmr.msra.gmra.mxu0 %v4021_v10  ;;  %2927 = vmatprep.mubr.msk.f32.mxu1 %vm3605_vm0, %v3604_v5 }
 0x207   : > { %2875 = vmatpush3.msra.mxu0 %v1022_v48  ;;  %2906 = vmatprep.mubr.f32.mxu0 %v828_v2 }
 0x208   : > { %2876 = vmatprep.subr.mxu0 %v1021_v11 }
 0x209   : > { %2877 = vmatpush3.msra.mxu0 %v1021_v11  ;;  %v1264_v11 = vld [vmem:[#allocation11] sm:$0xff] }
 0x20a   : > { %2878 = vmatprep.subr.mxu0 %v1020_v12 }
 0x20b   : > { %2879 = vmatpush3.msra.mxu0 %v1020_v12 }
 0x20c   : > { %2880 = vmatprep.subr.mxu0 %v1019_v13 }
 0x20d   : > { %2881 = vmatpush3.msra.mxu0 %v1019_v13 }
 0x20e   : > { %2882 = vmatprep.subr.mxu0 %v1018_v14 }
 0x20f   : > { %2883 = vmatpush3.msra.mxu0 %v1018_v14 }
 0x210   : > { %2884 = vmatprep.subr.mxu0 %v1017_v15 }
 0x211   : > { %2885 = vmatpush3.msra.mxu0 %v1017_v15 }
 0x212   : > { %2886 = vmatprep.subr.mxu0 %v1016_v16 }
 0x213   : > { %2887 = vmatpush3.msra.mxu0 %v1016_v16 }
 0x214   : > { %2888 = vmatprep.subr.mxu0 %v1015_v17 }
 0x215   : > { %2889 = vmatpush3.msra.mxu0 %v1015_v17 }
 0x216   : > { %2890 = vmatprep.subr.mxu0 %v1014_v18 }
 0x217   : > { %2891 = vmatpush3.msra.mxu0 %v1014_v18 }
 0x218   : > { %2892 = vmatprep.subr.mxu0 %v1013_v19 }
 0x219   : > { %2893 = vmatpush3.msra.mxu0 %v1013_v19 }
 0x21a   : > { %2894 = vmatprep.subr.mxu0 %v1012_v20 }
 0x21b   : > { %2895 = vmatpush3.msra.mxu0 %v1012_v20 }
 0x21c   : > { %2896 = vmatprep.subr.mxu0 %v1011_v21 }
 0x21d   : > { %2897 = vmatpush3.msra.mxu0 %v1011_v21 }
 0x21e   : > { %2898 = vmatprep.subr.mxu0 %v1010_v22 }
 0x21f   : > { %2899 = vmatpush3.msra.mxu0 %v1010_v22 }
 0x220   : > { %2900 = vmatprep.subr.mxu0 %v1009_v23 }
 0x221   : > { %2901 = vmatpush3.msra.mxu0 %v1009_v23 }
 0x222   : > { %2902 = vmatprep.subr.mxu0 %v1008_v24 }
 0x223   : > { %2903 = vmatpush3.msra.mxu0 %v1008_v24 }
 0x224   : > { %2904 = vmatprep.subr.mxu0 %v1007_v25 }
 0x225   : > { %2905 = vmatpush3.msra.mxu0 %v1007_v25  ;;  %v1769_v25 = vld [vmem:[#allocation11 + $0x58] sm:$0xff] }
 0x226   : > { %2907 = vmatmul.mubr.f32.vlgmr.msra.gmra.mxu0 %v829_v9  ;;  %2909 = vmatprep.subr.mxu0 %v3604_v5  ;;  %v1265_v9 = vld [vmem:[#allocation11 + $0x8] sm:$0xff] }
 0x227   : > { %2913 = vmatprep.mubr.msk.f32.mxu0 %vm3605_vm0, %v3604_v5 }
 0x2c5   : > { %v4029_v26 = vpop.f32.mrf.mxu1 }
 0x2c6   : > { %v4031_v27 = vpop.f32.mrf.mxu0  ;;  %1272 = vrot.lane.b32.xlu0 %v4029_v26, %s3606_s9  ;;  %2910 = vmatpush3.xpose.msk.msra.mxu0 %vm1098_vm1, %v4029_v26 }
 0x2c7   : > { %v4037_v28 = vpop.f32.mrf.mxu1  ;;  %2911 = vmatprep.subr.mxu0 %v3604_v5 }
 0x2c8   : > { %v2838_v29 = vpop.f32.mrf.mxu0  ;;  %1270 = vrot.lane.b32.xlu1 %v4037_v28, %s3606_s9 }
 0x2ca   : > { %2912 = vmatpush3.xpose.msk.msra.mxu0 %vm1098_vm1, %v4037_v28 }
 0x2cb   : > { %2916 = vmatprep.subr.mxu0 %v3604_v5 }
 0x2cc   : > { %1268 = vrot.lane.b32.xlu1 %v4031_v27, %s3606_s9 }
 0x2cd   : > { %2914 = vmatmul.mubr.msk.f32.vlgmr.msra.gmra.mxu0 %vm1098_vm1, %v4031_v27 }
 0x2ce   : > { %2920 = vmatprep.mubr.msk.f32.mxu0 %vm3605_vm0, %v3604_v5 }
 0x2e6   : > { %v4051_v30 = vpop.f32.mrf.mxu0 }
 0x2e7   : > { %2917 = vmatpush3.msra.mxu0 %v4051_v30 }
 0x2e8   : > { %v4054_v31 = vpop.f32.mrf.mxu0  ;;  %2918 = vmatprep.subr.mxu0 %v3604_v5 }
 0x2e9   : > { %2919 = vmatpush3.msra.mxu0 %v4054_v31 }
 0x2ea   : > { %2948 = vmatprep.subr.mxu0 %v3604_v5 }
 0x338   : > { %v1273_v32 = vpop.permute.xlu0 %1272 }
 0x339   : > { %2924 = vmatpush3.xpose.msk.msra.mxu1 %vm1098_vm1, %v1273_v32 }
 0x33a   : > { %v1271_v33 = vpop.permute.xlu1 %1270  ;;  %2925 = vmatprep.subr.mxu1 %v3604_v5 }
 0x33d   : > { %2926 = vmatpush3.xpose.msk.msra.mxu1 %vm1098_vm1, %v1271_v33 }
 0x33e   : > { %v1269_v34 = vpop.permute.xlu1 %1268  ;;  %2930 = vmatprep.subr.mxu1 %v3604_v5 }
 0x340   : > { %2928 = vmatmul.mubr.msk.f32.vlgmr.msra.gmra.mxu1 %vm1098_vm1, %v1269_v34 }
 0x341   : > { %2934 = vmatprep.mubr.msk.f32.mxu1 %vm3605_vm0, %v3604_v5 }
 0x38d   : > { %v1174_v35 = vpop.f32.mrf.mxu0 }
 0x38e   : > { %v1178_v46 = vmul.f32 0.17677669, %v1174_v35 }
 0x38f   : > { %v2915_v36 = vpop.f32.mrf.mxu0 }
 0x390   : > { %v1180_v47 = vsel %vm1179_vm2, %v1178_v46, -inf }
 0x400   : > { %v1346_v37 = vpop.f32.mrf.mxu1 }
 0x401   : > { %v1350_v38 = vmul.f32 0.17677669, %v1346_v37 }
 0x402   : > { %v2929_v39 = vpop.f32.mrf.mxu1 }
 0x403   : > { %v1351_v40 = vsel %vm1179_vm2, %v1350_v38, -inf }
 0x404   : > { %1352 = vmax.xlane.f32.xlu1 %v1351_v40  ;;  %v1766_v40 = vld [vmem:[#allocation11 + $0x40] sm:$0xff] }
 0x415   : > { %1364 = vrot.lane.b32.xlu1 %v4054_v31, %s3606_s9 }
 0x419   : > { %1597 = vrot.lane.b32.xlu1 %v4029_v26, %s3607_s23 }
 0x41d   : > { %1593 = vrot.lane.b32.xlu1 %v4031_v27, %s3607_s23 }
 0x48d   : > { %v1353_v41 = vpop.xlane.xlu1 %1352 }
 0x48e   : > { %v1354_v42 = vsub.f32 %v1350_v38, %v1353_v41 }
 0x490   : > { %v1355_v43 = vmul.f32 1.442695, %v1354_v42 }
 0x491   : > { %v1365_v50 = vpop.permute.xlu1 %1364 }
 0x492   : > { %3249 = vpow2.f32 %v1355_v43 }
 0x495   : > { %v1598_v63 = vpop.permute.xlu1 %1597 }
 0x499   : > { %v1594_v1 = vpop.permute.xlu1 %1593 }
 0x49f   : > { %v3250_v44 = vpop.eup %3249 }
 0x4a0   : > { %v1357_v45 = vsel %vm1179_vm2, %v3250_v44, 0.0 }
 0x4a1   : > { %1358 = vadd.xlane.f32.xlu0 %v1357_v45 }
 0x4b7   : > { %1366 = vrot.lane.b32.xlu0 %v4051_v30, %s3606_s9  ;;  %s4355_s9 = sld [smem:[#allocation39_spill]] }
 0x4bb   : > { %1595 = vrot.lane.b32.xlu0 %v4037_v28, %s3607_s23 }
 0x4da   : > { %1181 = vmax.xlane.f32.xlu0 %v1180_v47 }
 0x52a   : > { %v1359_v48 = vpop.xlane.xlu0 %1358 }
 0x52b   : > { %3251 = vrcp.f32 %v1359_v48 }
 0x52e   : > { %v1367_v49 = vpop.permute.xlu0 %1366 }
 0x52f   : > { %2931 = vmatpush3.msra.mxu1 %v1367_v49 }
 0x530   : > { %2932 = vmatprep.subr.mxu1 %v3604_v5 }
 0x531   : > { %2933 = vmatpush3.msra.mxu1 %v1365_v50 }
 0x532   : > { %2937 = vmatprep.subr.mxu1 %v3604_v5  ;;  %v1596_v57 = vpop.permute.xlu0 %1595 }
 0x538   : > { %v3252_v51 = vpop.eup %3251 }
 0x539   : > { %v1361_v52 = vmul.f32 %v3252_v51, %v3250_v44 }
 0x53b   : > { %2935 = vmatmul.mubr.msk.f32.vlgmr.msra.gmra.mxu1 %vm1179_vm2, %v1361_v52 }
 0x53c   : > { %2938 = vmatpush3.msra.mxu1 %v1446_v53  ;;  %2945 = vmatprep.mubr.msk.f32.mxu1 %vm3605_vm0, %v3604_v5 }
 0x53d   : > { %2939 = vmatprep.subr.mxu1 %v3604_v5 }
 0x53e   : > { %2940 = vmatpush3.msra.mxu1 %v1445_v54 }
 0x53f   : > { %2941 = vmatprep.subr.mxu1 %v3604_v5 }
 0x540   : > { %2942 = vmatpush3.msra.mxu1 %v1444_v55 }
 0x541   : > { %2943 = vmatprep.subr.mxu1 %v3604_v5 }
 0x542   : > { %2944 = vmatpush3.msra.mxu1 %v1443_v56  ;;  %v2020_v56 = vld [vmem:[#allocation11 + $0x78] sm:$0xff] }
 0x543   : > { %2959 = vmatprep.subr.mxu1 %v3604_v5 }
 0x563   : > { %v1182_v58 = vpop.xlane.xlu0 %1181 }
 0x564   : > { %v1183_v59 = vsub.f32 %v1178_v46, %v1182_v58 }
 0x566   : > { %v1184_v60 = vmul.f32 1.442695, %v1183_v59 }
 0x568   : > { %3253 = vpow2.f32 %v1184_v60 }
 0x575   : > { %v3254_v61 = vpop.eup %3253 }
 0x576   : > { %v1186_v62 = vsel %vm1179_vm2, %v3254_v61, 0.0 }
 0x577   : > { %1187 = vadd.xlane.f32.xlu1 %v1186_v62  ;;  %v2017_v62 = vld [vmem:[#allocation11 + $0x60] sm:$0xff] }
 0x588   : > { %1687 = vrot.lane.b32.xlu1 %v4054_v31, %s3607_s23 }
 0x58c   : > { %1848 = vrot.lane.b32.xlu1 %v4029_v26, %s3608_s7  ;;  %v1768_v26 = vld [vmem:[#allocation11 + $0x50] sm:$0xff] }
 0x590   : > { %1846 = vrot.lane.b32.xlu1 %v4037_v28, %s3608_s7  ;;  %v1767_v28 = vld [vmem:[#allocation11 + $0x48] sm:$0xff] }
 0x5fb   : > { %v1439_v0 = vpop.f32.mrf.mxu1 }
 0x5fc   : > { %2946 = vmatmul.mubr.msk.f32.vlgmr.msra.gmra.mxu1 %vm1098_vm1, %v1439_v0 }
 0x5fd   : > { %2960 = vmatpush3.xpose.msk.msra.mxu1 %vm1098_vm1, %v1598_v63  ;;  %v2936_v2 = vpop.f32.mrf.mxu1  ;;  %2963 = vmatprep.mubr.msk.f32.mxu1 %vm3605_vm0, %v3604_v5 }
 0x5fe   : > { %2961 = vmatprep.subr.mxu1 %v3604_v5  ;;  %v2645_v2 = vld [vmem:[%s4285_s10] ss:$0 sm:$0xff] }
 0x600   : > { %v1188_v3 = vpop.xlane.xlu1 %1187 }
 0x601   : > { %3255 = vrcp.f32 %v1188_v3  ;;  %2962 = vmatpush3.xpose.msk.msra.mxu1 %vm1098_vm1, %v1596_v57  ;;  %v2019_v57 = vld [vmem:[#allocation11 + $0x70] sm:$0xff] }
 0x602   : > { %2973 = vmatprep.subr.mxu1 %v3604_v5 }
 0x604   : > { %2964 = vmatmul.mubr.msk.f32.vlgmr.msra.gmra.mxu1 %vm1098_vm1, %v1594_v1  ;;  %v1688_v35 = vpop.permute.xlu1 %1687 }
 0x605   : > { %2981 = vmatprep.mubr.msk.f32.mxu1 %vm3605_vm0, %v3604_v5  ;;  %2974 = vmatpush3.msra.mxu1 %v1769_v25  ;;  %v2233_v25 = vld [vmem:[#allocation14 + $0x48] sm:$0xff] }
 0x606   : > { %2975 = vmatprep.subr.mxu1 %v3604_v5 }
 0x607   : > { %2976 = vmatpush3.msra.mxu1 %v1768_v26  ;;  %v2139_v26 = vld [vmem:[#allocation13 + $0x40] sm:$0xff] }
 0x608   : > { %2977 = vmatprep.subr.mxu1 %v3604_v5  ;;  %v1849_v36 = vpop.permute.xlu1 %1848 }
 0x609   : > { %2978 = vmatpush3.msra.mxu1 %v1767_v28  ;;  %v2232_v28 = vld [vmem:[#allocation14 + $0x40] sm:$0xff] }
 0x60a   : > { %2979 = vmatprep.subr.mxu1 %v3604_v5 }
 0x60b   : > { %2980 = vmatpush3.msra.mxu1 %v1766_v40  ;;  %v2133_v40 = vld [vmem:[#allocation13 + $0x10] sm:$0xff] }
 0x60c   : > { %v1847_v38 = vpop.permute.xlu1 %1846  ;;  %2991 = vmatprep.subr.mxu1 %v3604_v5 }
 0x60e   : > { %v3256_v4 = vpop.eup %3255 }
 0x60f   : > { %v1190_v6 = vmul.f32 %v3256_v4, %v3254_v61 }
 0x611   : > { %2921 = vmatmul.mubr.msk.f32.vlgmr.msra.gmra.mxu0 %vm1179_vm2, %v1190_v6 }
 0x612   : > { %2956 = vmatprep.mubr.msk.f32.mxu0 %vm3605_vm0, %v3604_v5  ;;  %2949 = vmatpush3.msra.mxu0 %v1267_v7 }
 0x613   : > { %2950 = vmatprep.subr.mxu0 %v3604_v5 }
 0x614   : > { %2951 = vmatpush3.msra.mxu0 %v1266_v8  ;;  %v2146_v8 = vld [vmem:[#allocation13 + $0x78] sm:$0xff] }
 0x615   : > { %2952 = vmatprep.subr.mxu0 %v3604_v5 }
 0x616   : > { %2953 = vmatpush3.msra.mxu0 %v1265_v9  ;;  %v2239_v9 = vld [vmem:[#allocation14 + $0x78] sm:$0xff] }
 0x617   : > { %2954 = vmatprep.subr.mxu0 %v3604_v5 }
 0x618   : > { %2955 = vmatpush3.msra.mxu0 %v1264_v11  ;;  %v2145_v11 = vld [vmem:[#allocation13 + $0x70] sm:$0xff] }
 0x619   : > { %2966 = vmatprep.subr.mxu0 %v3604_v5 }
 0x6bc   : > { %v4112_v12 = vpop.f32.mrf.mxu1 }
 0x6be   : > { %v2947_v13 = vpop.f32.mrf.mxu1 }
 0x6bf   : > { %v2144_v13 = vld [vmem:[#allocation13 + $0x68] sm:$0xff] }
 0x6c4   : > { %v1671_v14 = vpop.f32.mrf.mxu1 }
 0x6c5   : > { %v1675_v15 = vmul.f32 0.17677669, %v1671_v14  ;;  %v2237_v14 = vld [vmem:[#allocation14 + $0x68] sm:$0xff] }
 0x6c6   : > { %v2965_v16 = vpop.f32.mrf.mxu1 }
 0x6c7   : > { %v1676_v17 = vsel %vm1179_vm2, %v1675_v15, -inf }
 0x6c8   : > { %1677 = vmax.xlane.f32.xlu0 %v1676_v17 }
 0x6d1   : > { %v1260_v18 = vpop.f32.mrf.mxu0 }
 0x6d2   : > { %2957 = vmatmul.mubr.msk.f32.vlgmr.msra.gmra.mxu0 %vm1098_vm1, %v1260_v18 }
 0x6d3   : > { %v2922_v19 = vpop.f32.mrf.mxu0  ;;  %2970 = vmatprep.mubr.msk.f32.mxu0 %vm3605_vm0, %v3604_v5 }
 0x751   : > { %v1678_v20 = vpop.xlane.xlu0 %1677 }
 0x752   : > { %v1679_v21 = vsub.f32 %v1675_v15, %v1678_v20  ;;  %v2236_v15 = vld [vmem:[#allocation14 + $0x60] sm:$0xff]  ;;  %v2142_v20 = vld [vmem:[#allocation13 + $0x58] sm:$0xff] }
 0x754   : > { %v1680_v22 = vmul.f32 1.442695, %v1679_v21  ;;  %v2235_v21 = vld [vmem:[#allocation14 + $0x58] sm:$0xff] }
 0x756   : > { %3257 = vpow2.f32 %v1680_v22  ;;  %v2141_v22 = vld [vmem:[#allocation13 + $0x50] sm:$0xff] }
 0x763   : > { %v3258_v23 = vpop.eup %3257 }
 0x764   : > { %v1682_v24 = vsel %vm1179_vm2, %v3258_v23, 0.0 }
 0x765   : > { %1683 = vadd.xlane.f32.xlu0 %v1682_v24  ;;  %v2140_v24 = vld [vmem:[#allocation13 + $0x48] sm:$0xff] }
 0x77b   : > { %1689 = vrot.lane.b32.xlu0 %v4051_v30, %s3607_s23  ;;  %s2652_s23 = sshll.u32 %s3731_s2, 7  ;;  %s3609_s2 = smov [#allocation17]  }
 0x77c   : > { %s2434_s17 = scalar_lea.hbm %s4356_s24, %s2652_s23  ;;  %s3511_s22 = sshll.u32 %s3609_s2, 4  ;;  %s3512_s22 = int_to_ptr.vmem [resolvable:$false] %s3511_s22 }
 0x77f   : > { %1844 = vrot.lane.b32.xlu0 %v4031_v27, %s3608_s7 }
 0x792   : > { %v1589_v29 = vpop.f32.mrf.mxu0 }
 0x793   : > { %v1590_v52 = vadd.f32 %v1589_v29, %v4112_v12  ;;  %v2238_v12 = vld [vmem:[#allocation14 + $0x70] sm:$0xff]  ;;  %v2138_v29 = vld [vmem:[#allocation13 + $0x38] sm:$0xff] }
 0x794   : > { %v2958_v32 = vpop.f32.mrf.mxu0 }
 0x795   : > { %v2231_v32 = vld [vmem:[#allocation14 + $0x38] sm:$0xff] }
 0x7ee   : > { %v1684_v33 = vpop.xlane.xlu0 %1683 }
 0x7ef   : > { %3259 = vrcp.f32 %v1684_v33  ;;  %v2137_v33 = vld [vmem:[#allocation13 + $0x30] sm:$0xff] }
 0x7f2   : > { %v1690_v34 = vpop.permute.xlu0 %1689 }
 0x7f3   : > { %2967 = vmatpush3.msra.mxu0 %v1690_v34  ;;  %v2230_v34 = vld [vmem:[#allocation14 + $0x30] sm:$0xff] }
 0x7f4   : > { %2968 = vmatprep.subr.mxu0 %v3604_v5 }
 0x7f5   : > { %2969 = vmatpush3.msra.mxu0 %v1688_v35  ;;  %v2136_v35 = vld [vmem:[#allocation13 + $0x28] sm:$0xff] }
 0x7f6   : > { %2984 = vmatprep.subr.mxu0 %v3604_v5  ;;  %v1845_v39 = vpop.permute.xlu0 %1844 }
 0x7fc   : > { %v3260_v27 = vpop.eup %3259 }
 0x7fd   : > { %v1686_v37 = vmul.f32 %v3260_v27, %v3258_v23  ;;  %v2234_v23 = vld [vmem:[#allocation14 + $0x50] sm:$0xff]  ;;  %v2229_v27 = vld [vmem:[#allocation14 + $0x28] sm:$0xff] }
 0x7ff   : > { %2971 = vmatmul.mubr.msk.f32.vlgmr.msra.gmra.mxu0 %vm1179_vm2, %v1686_v37  ;;  %v2228_v37 = vld [vmem:[#allocation14 + $0x20] sm:$0xff] }
 0x800   : > { %2985 = vmatpush3.xpose.msk.msra.mxu0 %vm1098_vm1, %v1849_v36  ;;  %2988 = vmatprep.mubr.msk.f32.mxu0 %vm3605_vm0, %v3604_v5  ;;  %v2135_v36 = vld [vmem:[#allocation13 + $0x20] sm:$0xff] }
 0x801   : > { %2986 = vmatprep.subr.mxu0 %v3604_v5 }
 0x804   : > { %2987 = vmatpush3.xpose.msk.msra.mxu0 %vm1098_vm1, %v1847_v38  ;;  %v2134_v38 = vld [vmem:[#allocation13 + $0x18] sm:$0xff] }
 0x805   : > { %2998 = vmatprep.subr.mxu0 %v3604_v5 }
 0x807   : > { %2989 = vmatmul.mubr.msk.f32.vlgmr.msra.gmra.mxu0 %vm1098_vm1, %v1845_v39  ;;  %v2227_v39 = vld [vmem:[#allocation14 + $0x18] sm:$0xff] }
 0x808   : > { %3006 = vmatprep.mubr.msk.f32.mxu0 %vm3605_vm0, %v3604_v5  ;;  %2999 = vmatpush3.msra.mxu0 %v2020_v56  ;;  %v2341_v56 = vld [vmem:[#allocation16 + $0x70] sm:$0xff] }
 0x809   : > { %3000 = vmatprep.subr.mxu0 %v3604_v5 }
 0x80a   : > { %3001 = vmatpush3.msra.mxu0 %v2019_v57  ;;  %v2340_v57 = vld [vmem:[#allocation16 + $0x68] sm:$0xff] }
 0x80b   : > { %3002 = vmatprep.subr.mxu0 %v3604_v5 }
 0x8bf   : > { %v1762_v41 = vpop.f32.mrf.mxu0 }
 0x8c0   : > { %2982 = vmatmul.mubr.msk.f32.vlgmr.msra.gmra.mxu1 %vm1098_vm1, %v1762_v41  ;;  %v2226_v41 = vld [vmem:[#allocation14 + $0x10] sm:$0xff] }
 0x8c1   : > { %v2972_v42 = vpop.f32.mrf.mxu0  ;;  %2995 = vmatprep.mubr.msk.f32.mxu1 %vm3605_vm0, %v3604_v5 }
 0x8c2   : > { %v2132_v42 = vld [vmem:[#allocation13 + $0x8] sm:$0xff] }
 0x8c7   : > { %v1922_v43 = vpop.f32.mrf.mxu0 }
 0x8c8   : > { %v1926_v44 = vmul.f32 0.17677669, %v1922_v43  ;;  %v2225_v43 = vld [vmem:[#allocation14 + $0x8] sm:$0xff] }
 0x8c9   : > { %v2990_v45 = vpop.f32.mrf.mxu0 }
 0x8ca   : > { %v1927_v46 = vsel %vm1179_vm2, %v1926_v44, -inf  ;;  %v2224_v45 = vld [vmem:[#allocation14] sm:$0xff] }
 0x8cb   : > { %1928 = vmax.xlane.f32.xlu1 %v1927_v46 }
 0x8dc   : > { %1938 = vrot.lane.b32.xlu1 %v4054_v31, %s3608_s7  ;;  %v2018_v31 = vld [vmem:[#allocation11 + $0x68] sm:$0xff] }
 0x8dd   : > { %3003 = vmatpush3.msra.mxu0 %v2018_v31  ;;  %v2339_v31 = vld [vmem:[#allocation16 + $0x60] sm:$0xff] }
 0x8de   : > { %3004 = vmatprep.subr.mxu0 %v3604_v5 }
 0x8df   : > { %3005 = vmatpush3.msra.mxu0 %v2017_v62  ;;  %v2333_v62 = vld [vmem:[#allocation16 + $0x30] sm:$0xff] }
 0x8e0   : > { %3044 = vmatprep.subr.mxu0 %v3604_v5 }
 0x954   : > { %v1929_v47 = vpop.xlane.xlu1 %1928 }
 0x955   : > { %v1930_v48 = vsub.f32 %v1926_v44, %v1929_v47  ;;  %v2131_v44 = vld [vmem:[#allocation13] sm:$0xff] }
 0x957   : > { %v1931_v49 = vmul.f32 1.442695, %v1930_v48 }
 0x958   : > { %v1939_v59 = vpop.permute.xlu1 %1938 }
 0x959   : > { %3261 = vpow2.f32 %v1931_v49 }
 0x966   : > { %v3262_v50 = vpop.eup %3261 }
 0x967   : > { %v1933_v51 = vsel %vm1179_vm2, %v3262_v50, 0.0 }
 0x968   : > { %1934 = vadd.xlane.f32.xlu0 %v1933_v51 }
 0x97e   : > { %1940 = vrot.lane.b32.xlu0 %v4051_v30, %s3608_s7  ;;  %s758_s7 = scalar_lea.vmem [#allocation17], %s2611_s13  ;;  %s3513_s13 = scalar_lea.vmem %s3512_s22, 256 }
 0x97f   : > { %s2436_s26 = sshll.u32 %s758_s7, 4  ;;  %s2437_s26 = int_to_ptr.vmem [resolvable:$true] %s2436_s26 }
 0x980   : > { %v1839_v53 = vpop.f32.mrf.mxu1  ;;  %s3507_s27 = scalar_lea.vmem %s2437_s26, 128  ;;  %p3514_p0 = scmp.lt.s32.totalorder %s2437_s26, %s3512_s22 }
 0x981   : > { %v1843_v54 = vadd.f32 %v1839_v53, %v1590_v52  ;;  %v2647_v52 = vld [vmem:[%s4287_s12] ss:$0 sm:$0xff]  ;;  %p3508_p12 = scmp.ne.s32.totalorder %s2437_s26, %s3507_s27  ;;  %p3515_p4 = scmp.lt.s32.totalorder %s3513_s13, %s3507_s27 }
 0x982   : > { %v2983_v55 = vpop.f32.mrf.mxu1 }
 0x983   : > { %v2342_v55 = vld [vmem:[#allocation16 + $0x78] sm:$0xff]  ;;  %p3509_p1 = pnand %p3508_p12, %p4357_p13  ;;  %p3516_p7 = por %p3515_p4, %p3514_p0 }
 0x985   : > { %p3510_p3 = pneg %p3509_p1 }
 0x987   : > { %p3517_p8 = pnand %p3516_p7, %p3510_p3 }
 0x9f1   : > { %v1935_v58 = vpop.xlane.xlu0 %1934 }
 0x9f2   : > { %3263 = vrcp.f32 %v1935_v58  ;;  %v2338_v58 = vld [vmem:[#allocation16 + $0x58] sm:$0xff] }
 0x9f5   : > { %v1941_v30 = vpop.permute.xlu0 %1940 }
 0x9f6   : > { %2992 = vmatpush3.msra.mxu1 %v1941_v30  ;;  %v2337_v30 = vld [vmem:[#allocation16 + $0x50] sm:$0xff] }
 0x9f7   : > { %2993 = vmatprep.subr.mxu1 %v3604_v5 }
 0x9f8   : > { %2994 = vmatpush3.msra.mxu1 %v1939_v59  ;;  %v2336_v59 = vld [vmem:[#allocation16 + $0x48] sm:$0xff] }
 0x9f9   : > { %3009 = vmatprep.subr.mxu1 %v3604_v5 }
 0x9ff   : > { %v3264_v60 = vpop.eup %3263 }
 0xa00   : > { %v1937_v61 = vmul.f32 %v3264_v60, %v3262_v50  ;;  %v2646_v50 = vld [vmem:[%s4286_s11] ss:$0 sm:$0xff]  ;;  %v2335_v60 = vld [vmem:[#allocation16 + $0x40] sm:$0xff] }
 0xa02   : > { %2996 = vmatmul.mubr.msk.f32.vlgmr.msra.gmra.mxu1 %vm1179_vm2, %v1937_v61  ;;  %v2334_v61 = vld [vmem:[#allocation16 + $0x38] sm:$0xff] }
 0xa03   : > { %3041 = vmatprep.mubr.msk.f32.mxu1 %vm3605_vm0, %v3604_v5  ;;  %3010 = vmatpush3.msra.mxu1 %v2146_v8 }
 0xa04   : > { %3011 = vmatprep.subr.mxu1 %v3604_v5 }
 0xa05   : > { %3012 = vmatpush3.msra.mxu1 %v2145_v11 }
 0xa06   : > { %3013 = vmatprep.subr.mxu1 %v3604_v5 }
 0xa07   : > { %3014 = vmatpush3.msra.mxu1 %v2144_v13 }
 0xa08   : > { %3015 = vmatprep.subr.mxu1 %v3604_v5 }
 0xac2   : > { %v2013_v63 = vpop.f32.mrf.mxu1 }
 0xac3   : > { %3007 = vmatmul.mubr.msk.f32.vlgmr.msra.gmra.mxu0 %vm1098_vm1, %v2013_v63  ;;  %v2332_v63 = vld [vmem:[#allocation16 + $0x28] sm:$0xff] }
 0xac4   : > { %v2997_v0 = vpop.f32.mrf.mxu1  ;;  %3076 = vmatprep.mubr.msk.f32.mxu0 %vm3605_vm0, %v3604_v5  ;;  %3045 = vmatpush3.msra.mxu0 %v2239_v9 }
 0xac5   : > { %3046 = vmatprep.subr.mxu0 %v3604_v5  ;;  %v2331_v0 = vld [vmem:[#allocation16 + $0x20] sm:$0xff] }
 0xac6   : > { %3047 = vmatpush3.msra.mxu0 %v2238_v12 }
 0xac7   : > { %3048 = vmatprep.subr.mxu0 %v3604_v5 }
 0xac8   : > { %3049 = vmatpush3.msra.mxu0 %v2237_v14 }
 0xac9   : > { %3050 = vmatprep.subr.mxu0 %v3604_v5 }
 0xaca   : > { %3051 = vmatpush3.msra.mxu0 %v2236_v15 }
 0xacb   : > { %3052 = vmatprep.subr.mxu0 %v3604_v5 }
 0xacc   : > { %3053 = vmatpush3.msra.mxu0 %v2235_v21 }
 0xacd   : > { %3054 = vmatprep.subr.mxu0 %v3604_v5 }
 0xace   : > { %3055 = vmatpush3.msra.mxu0 %v2234_v23  ;;  %v2650_v23 = vld [vmem:[%s4355_s9] ss:$0 sm:$0xff] }
 0xacf   : > { %3056 = vmatprep.subr.mxu0 %v3604_v5 }
 0xad0   : > { %3057 = vmatpush3.msra.mxu0 %v2233_v25 }
 0xad1   : > { %3058 = vmatprep.subr.mxu0 %v3604_v5 }
 0xad2   : > { %3059 = vmatpush3.msra.mxu0 %v2232_v28 }
 0xad3   : > { %3060 = vmatprep.subr.mxu0 %v3604_v5 }
 0xad4   : > { %3061 = vmatpush3.msra.mxu0 %v2231_v32 }
 0xad5   : > { %3062 = vmatprep.subr.mxu0 %v3604_v5 }
 0xad6   : > { %3063 = vmatpush3.msra.mxu0 %v2230_v34 }
 0xad7   : > { %3064 = vmatprep.subr.mxu0 %v3604_v5 }
 0xad8   : > { %3065 = vmatpush3.msra.mxu0 %v2229_v27 }
 0xad9   : > { %3066 = vmatprep.subr.mxu0 %v3604_v5 }
 0xada   : > { %3067 = vmatpush3.msra.mxu0 %v2228_v37 }
 0xadb   : > { %3068 = vmatprep.subr.mxu0 %v3604_v5 }
 0xadc   : > { %3069 = vmatpush3.msra.mxu0 %v2227_v39 }
 0xadd   : > { %3070 = vmatprep.subr.mxu0 %v3604_v5 }
 0xade   : > { %3071 = vmatpush3.msra.mxu0 %v2226_v41 }
 0xadf   : > { %3072 = vmatprep.subr.mxu0 %v3604_v5 }
 0xae0   : > { %3073 = vmatpush3.msra.mxu0 %v2225_v43 }
 0xae1   : > { %3074 = vmatprep.subr.mxu0 %v3604_v5 }
 0xae2   : > { %3075 = vmatpush3.msra.mxu0 %v2224_v45 }
 0xb83   : > { %v2090_v1 = vpop.f32.mrf.mxu0 }
 0xb84   : > { %v2094_v3 = vadd.f32 %v2090_v1, %v1843_v54  ;;  %v2330_v1 = vld [vmem:[#allocation16 + $0x18] sm:$0xff] }
 0xb85   : > { %v3008_v4 = vpop.f32.mrf.mxu0 }
 0xb86   : > { %v2102_v6 = vadd.f32 %v2645_v2, %v2094_v3  ;;  %v2329_v2 = vld [vmem:[#allocation16 + $0x10] sm:$0xff]  ;;  %v2328_v3 = vld [vmem:[#allocation16 + $0x8] sm:$0xff]  ;;  %v2327_v4 = vld [vmem:[#allocation16] sm:$0xff] }
 0xb88   : > { %v2103_v7 = vadd.f32 %v2102_v6, %v4021_v10  ;;  %v2143_v10 = vld [vmem:[#allocation13 + $0x60] sm:$0xff]  ;;  %v2649_v6 = vld [vmem:[%s4291_s16] ss:$0 sm:$0xff] }
 0xb89   : > { %3016 = vmatpush3.msra.mxu1 %v2143_v10 }
 0xb8a   : > { %2106 = vadd.xlane.f32.xlu1 %v2103_v7  ;;  %3017 = vmatprep.subr.mxu1 %v3604_v5 }
 0xb8b   : > { %3018 = vmatpush3.msra.mxu1 %v2142_v20 }
 0xb8c   : > { %3019 = vmatprep.subr.mxu1 %v3604_v5 }
 0xb8d   : > { %3020 = vmatpush3.msra.mxu1 %v2141_v22 }
 0xb8e   : > { %3021 = vmatprep.subr.mxu1 %v3604_v5 }
 0xb8f   : > { %3022 = vmatpush3.msra.mxu1 %v2140_v24 }
 0xb90   : > { %3023 = vmatprep.subr.mxu1 %v3604_v5 }
 0xb91   : > { %3024 = vmatpush3.msra.mxu1 %v2139_v26 }
 0xb92   : > { %3025 = vmatprep.subr.mxu1 %v3604_v5 }
 0xb93   : > { %3026 = vmatpush3.msra.mxu1 %v2138_v29 }
 0xb94   : > { %3027 = vmatprep.subr.mxu1 %v3604_v5 }
 0xb95   : > { %3028 = vmatpush3.msra.mxu1 %v2137_v33 }
 0xb96   : > { %3029 = vmatprep.subr.mxu1 %v3604_v5 }
 0xb97   : > { %3030 = vmatpush3.msra.mxu1 %v2136_v35 }
 0xb98   : > { %3031 = vmatprep.subr.mxu1 %v3604_v5 }
 0xb99   : > { %3032 = vmatpush3.msra.mxu1 %v2135_v36 }
 0xb9a   : > { %3033 = vmatprep.subr.mxu1 %v3604_v5 }
 0xb9b   : > { %3034 = vmatpush3.msra.mxu1 %v2134_v38 }
 0xb9c   : > { %3035 = vmatprep.subr.mxu1 %v3604_v5 }
 0xb9d   : > { %3036 = vmatpush3.msra.mxu1 %v2133_v40 }
 0xb9e   : > { %3037 = vmatprep.subr.mxu1 %v3604_v5 }
 0xb9f   : > { %3038 = vmatpush3.msra.mxu1 %v2132_v42 }
 0xba0   : > { %3039 = vmatprep.subr.mxu1 %v3604_v5 }
 0xba1   : > { %3040 = vmatpush3.msra.mxu1 %v2131_v44 }
 0xba2   : > { %3079 = vmatprep.subr.mxu1 %v3604_v5 }
 0xc13   : > { %v2107_v16 = vpop.xlane.xlu1 %2106 }
 0xc14   : > { %v2108_v17 = vmul.f32 0.0078125, %v2107_v16 }
 0xc16   : > { %v4173_v18 = vsub.f32 %v2103_v7, %v2108_v17 }
 0xc18   : > { %v2110_v19 = vmul.f32 %v4173_v18, %v4173_v18 }
 0xc1a   : > { %2111 = vadd.xlane.f32.xlu0 %v2110_v19 }
 0xca3   : > { %v2112_v46 = vpop.xlane.xlu0 %2111 }
 0xca4   : > { %v2113_v47 = vmul.f32 0.0078125, %v2112_v46 }
 0xca6   : > { %v2114_v48 = vadd.f32 1e-05, %v2113_v47 }
 0xca8   : > { %3265 = vrsqrt.f32 %v2114_v48 }
 0xcb5   : > { %v3266_v49 = vpop.eup %3265 }
 0xcb6   : > { %v2116_v51 = vmul.f32 %v3266_v49, %v4173_v18 }
 0xcb8   : > { %v2123_v53 = vmul.f32 %v2646_v50, %v2116_v51 }
 0xcba   : > { %v4207_v54 = vadd.f32 %v2647_v52, %v2123_v53 }
 0xcbc   : > { %3042 = vmatmul.mubr.f32.vlgmr.msra.gmra.mxu1 %v4207_v54  ;;  %3077 = vmatmul.mubr.f32.vlgmr.msra.gmra.mxu0 %v4207_v54 }
 0xcbd   : > { %3111 = vmatprep.mubr.msk.f32.mxu1 %vm3605_vm0, %v3604_v5  ;;  %3080 = vmatpush3.msra.mxu1 %v2342_v55 }
 0xcbe   : > { %3081 = vmatprep.subr.mxu1 %v3604_v5 }
 0xcbf   : > { %3082 = vmatpush3.msra.mxu1 %v2341_v56 }
 0xcc0   : > { %3083 = vmatprep.subr.mxu1 %v3604_v5 }
 0xcc1   : > { %3084 = vmatpush3.msra.mxu1 %v2340_v57 }
 0xcc2   : > { %3085 = vmatprep.subr.mxu1 %v3604_v5 }
 0xcc3   : > { %3086 = vmatpush3.msra.mxu1 %v2339_v31 }
 0xcc4   : > { %3087 = vmatprep.subr.mxu1 %v3604_v5 }
 0xcc5   : > { %3088 = vmatpush3.msra.mxu1 %v2338_v58 }
 0xcc6   : > { %3089 = vmatprep.subr.mxu1 %v3604_v5 }
 0xcc7   : > { %3090 = vmatpush3.msra.mxu1 %v2337_v30 }
 0xcc8   : > { %3091 = vmatprep.subr.mxu1 %v3604_v5 }
 0xcc9   : > { %3092 = vmatpush3.msra.mxu1 %v2336_v59 }
 0xcca   : > { %3093 = vmatprep.subr.mxu1 %v3604_v5 }
 0xccb   : > { %3094 = vmatpush3.msra.mxu1 %v2335_v60 }
 0xccc   : > { %3095 = vmatprep.subr.mxu1 %v3604_v5 }
 0xccd   : > { %3096 = vmatpush3.msra.mxu1 %v2334_v61 }
 0xcce   : > { %3097 = vmatprep.subr.mxu1 %v3604_v5 }
 0xccf   : > { %3098 = vmatpush3.msra.mxu1 %v2333_v62 }
 0xcd0   : > { %3099 = vmatprep.subr.mxu1 %v3604_v5 }
 0xcd1   : > { %3100 = vmatpush3.msra.mxu1 %v2332_v63 }
 0xcd2   : > { %3101 = vmatprep.subr.mxu1 %v3604_v5 }
 0xcd3   : > { %3102 = vmatpush3.msra.mxu1 %v2331_v0 }
 0xcd4   : > { %3103 = vmatprep.subr.mxu1 %v3604_v5 }
 0xcd5   : > { %3104 = vmatpush3.msra.mxu1 %v2330_v1 }
 0xcd6   : > { %3105 = vmatprep.subr.mxu1 %v3604_v5 }
 0xcd7   : > { %3106 = vmatpush3.msra.mxu1 %v2329_v2 }
 0xcd8   : > { %3107 = vmatprep.subr.mxu1 %v3604_v5 }
 0xcd9   : > { %3108 = vmatpush3.msra.mxu1 %v2328_v3 }
 0xcda   : > { %3109 = vmatprep.subr.mxu1 %v3604_v5  ;;  %v2648_v5 = vld [vmem:[%s4290_s15] ss:$0 sm:$0xff] }
 0xcdb   : > { %3110 = vmatpush3.msra.mxu1 %v2327_v4 }
 0xd7c   : > { %v2220_v7 = vpop.f32.mrf.mxu1  ;;  %v2313_v8 = vpop.f32.mrf.mxu0 }
 0xd7d   : > { %v2314_v9 = vadd.f32 %v2649_v6, %v2313_v8  ;;  %v2221_v20 = vadd.f32 %v2648_v5, %v2220_v7 }
 0xd7e   : > { %v3043_v11 = vpop.f32.mrf.mxu1  ;;  %v3078_v12 = vpop.f32.mrf.mxu0 }
 0xd7f   : > { %v2318_v13 = vmul.f32 0.044715, %v2314_v9  ;;  %v2317_v18 = vmul.f32 0.5, %v2314_v9 }
 0xd81   : > { %v2319_v14 = vmul.f32 %v2318_v13, %v2314_v9 }
 0xd83   : > { %v2320_v10 = vmul.f32 %v2319_v14, %v2314_v9 }
 0xd85   : > { %v2321_v15 = vadd.f32 %v2320_v10, %v2314_v9 }
 0xd87   : > { %v2322_v16 = vmul.f32 0.7978846, %v2321_v15 }
 0xd89   : > { %3267 = vtanh.f32 %v2322_v16 }
 0xd96   : > { %v3268_v17 = vpop.eup %3267 }
 0xd97   : > { %v2324_v19 = vadd.f32 1.0, %v3268_v17 }
 0xd99   : > { %v2325_v21 = vmul.f32 %v2324_v19, %v2317_v18 }
 0xd9b   : > { %v2326_v22 = vmul.f32 %v2325_v21, %v2221_v20 }
 0xd9d   : > { %3112 = vmatmul.mubr.f32.vlgmr.msra.gmra.mxu1 %v2326_v22 }
 0xe5d   : > { %v2416_v24 = vpop.f32.mrf.mxu1 }
 0xe5e   : > { %v2417_v25 = vadd.f32 %v2650_v23, %v2416_v24 }
 0xe5f   : > { %v3113_v26 = vpop.f32.mrf.mxu1 }
 0xe60   : > { %v2420_v28 = vadd.f32 %v2417_v25, %v4207_v54 }
 0xe62   : > { %2421 = vst [vmem:[%s758_s7] sm:$0xff] %v2420_v28 }
 0xe63   : > { %3520 = shalt.err (!%p3517_p8)
}
 0xe64   : > { %s3521_s3 = scalar_lea.hbm %s2434_s17, 128  ;;  %s3525_s20 = scalar_lea.hbm %s4356_s24, 256 }
 0xe65   : > { %p3522_p6 = scmp.ne.s32.totalorder %s2434_s17, %s3521_s3  ;;  %p3526_p5 = scmp.lt.s32.totalorder %s2434_s17, %s4356_s24 }
 0xe66   : > { %p3527_p10 = scmp.lt.s32.totalorder %s3525_s20, %s3521_s3 }
 0xe67   : > { %p3523_p11 = pnand %p3522_p6, %p4357_p13 }
 0xe68   : > { %p3528_p9 = por %p3527_p10, %p3526_p5 }
 0xe69   : > { %p3524_p2 = pneg %p3523_p11 }
 0xe6b   : > { %p3529_p12 = pnand %p3528_p9, %p3524_p2 }
 0xe6d   : > { %3532 = shalt.err (!%p3529_p12)
}
 0xe6e   : > { %3146 = dma.vmem_to_hbm [thread:$0]  (%p4357_p13), %s2437_s26, 128, %s2434_s17, %s2423_s29  }
 0xe6f PF: > { %s2448_s23 = sand.u32 1, %s3579_s0   ;;  %p4358_p1 = scmp.ne.s32.totalorder %s4336_s25, 0 }
 0xe70   : > { %p4359_p3 = scmp.ge.s32.totalorder %s3591_s21, 2  ;;  %s2449_s7 = scalar_lea.sflag [#allocation4], %s2448_s23 }
 0xe72   : > { %p3178_p0 = pnand %p4359_p3, %p4358_p1 }
 0xe74   : > { %p3179_p4 = pneg %p3178_p0 }
 0xe76   : > { %3574 = dma.done.wait (%p3179_p4), %s2449_s7, 128  }
 0xe77   : > { %3576 = vsyncadd (%p3179_p4), %s2449_s7, 4294967168  ;;  %s4360_s21 = sld [smem:[#allocation26_spill]]  ;;  %s4363_s0 = smov %s3583_s30 }
 0xe78   : > { %s4361_s19 = sld [smem:[#allocation25_spill]] }
 0xe79   : > { %s4362_s20 = sld [smem:[#allocation27_spill]] }
 0xe7d   : > { %p38_p7 = scmp.ge.s32.totalorder %s4360_s21, 4  }
 0xe7e   : > { %s4364_s30 = smov %s4361_s19 }
 0xe7f   :  { %40 = sbr.rel (!%p38_p7) target bundleno = 24 (0x18), region = 182 }
 0xe84   :  { %2454 = vsyncpa [#allocation3], 1 }
 0xe85   :  { %2456 = vsyncpa [#allocation3 + $0x1], 1 }
 0xe86   :  { %2457 = vsyncpa [#allocation6], 1 }
 0xe87   :  { %2459 = vsyncpa [#allocation6 + $0x1], 1 }
 0xe88   :  { %2460 = vsyncpa [#allocation9], 1 }
 0xe89   :  { %2461 = vsyncpa [#allocation12], 1 }
 0xe8a   :  { %2462 = vsyncpa [#allocation15], 1 }
 0xe8b   :  { %2463 = vsyncpa [#allocation4], 1 }
 0xe8c   :  { %2465 = vsyncpa [#allocation4 + $0x1], 1 }

</bundles_post_ra>
